<compile_context>
chip_gen: v7x
topology: tpu7x:2x2x1
jax: 0.10.0
libtpu: 0.0.40
codegen_flags: <defaults>
</compile_context>

<pallas_src>
import jax
import jax.numpy as jnp
from jax.experimental import pallas as pl
from jax.experimental.pallas import tpu as pltpu

C_IN = 2048   # fixed by nn.Linear(2048, 256)
C_OUT = 256


def _embeder_kernel(x_ref, w_ref, b_ref, o_ref):
    # x_ref: (TN, HW, C_IN) lane-dense (C on lanes)
    # w_ref: (C_IN, C_OUT) with 1/(H*W) pre-folded; b_ref: (1, C_OUT)
    # o_ref: (TN, C_OUT)
    # Global average pool == spatial sum (scale already folded into weight);
    # accumulate in f32 so bf16 activations would also keep full precision.
    pooled = jnp.sum(x_ref[...], axis=1, dtype=jnp.float32)            # (TN, C_IN)
    out = jnp.dot(pooled, w_ref[...], preferred_element_type=jnp.float32)
    o_ref[...] = (out + b_ref[...]).astype(o_ref.dtype)


def _pick_batch_tile(n, hw, itemsize):
    """Keep each (TN, HW, C_IN) input tile at ~<=4 MiB so the double-buffered
    pipeline fits scoped VMEM on v5e/v6e/v7x while amortizing per-step overhead."""
    budget_rows = max(1, (4 * 1024 * 1024) // (hw * C_IN * itemsize))
    tn = min(n, budget_rows, 128)
    if tn >= 8:
        tn = (tn // 8) * 8      # align the matmul M dim when batch allows
    return max(tn, 1)


def embeder_forward(features, weight, bias):
    """features: (N, C_IN, H, W); weight: (C_OUT, C_IN); bias: (C_OUT,)."""
    n, c, h, w = features.shape
    assert c == C_IN
    hw = h * w

    # Lane-dense layout: put C_IN=2048 on the 128-lane axis.
    # TODO(synk): ideally the producer hands us NHWC activations so this
    # wrapper transpose (one extra HBM round trip) disappears entirely.
    x = jnp.transpose(features, (0, 2, 3, 1)).reshape(n, hw, c)

    # Fold the 1/(H*W) average-pool scale into the VMEM-resident weight.
    w_scaled = (weight.T / jnp.float32(hw)).astype(jnp.float32)        # (C_IN, C_OUT)
    b2 = bias.reshape(1, C_OUT).astype(jnp.float32)

    tn = _pick_batch_tile(n, hw, x.dtype.itemsize)
    grid = (pl.cdiv(n, tn),)

    cost = pl.CostEstimate(
        flops=2 * n * C_IN * C_OUT + n * hw * C_IN,
        transcendentals=0,
        bytes_accessed=(n * hw * C_IN * x.dtype.itemsize
                        + C_IN * C_OUT * 4
                        + C_OUT * 4
                        + n * C_OUT * 4),
    )

    out = pl.pallas_call(
        _embeder_kernel,
        out_shape=jax.ShapeDtypeStruct((n, C_OUT), jnp.float32),
        grid=grid,
        in_specs=[
            pl.BlockSpec((tn, hw, C_IN), lambda i: (i, 0, 0)),   # batch-tiled x
            pl.BlockSpec((C_IN, C_OUT), lambda i: (0, 0)),       # resident weight
            pl.BlockSpec((1, C_OUT), lambda i: (0, 0)),          # resident bias
        ],
        out_specs=pl.BlockSpec((tn, C_OUT), lambda i: (i, 0)),
        compiler_params=pltpu.CompilerParams(
            dimension_semantics=("parallel",),
            vmem_limit_bytes=32 * 1024 * 1024,
        ),
        cost_estimate=cost,
    )(x, w_scaled, b2)

    # torch.squeeze semantics: (N, 256) for N > 1, (256,) for N == 1.
    return jnp.squeeze(out)


if __name__ == "__main__":
    key = jax.random.PRNGKey(0)
    k1, k2, k3 = jax.random.split(key, 3)

    # Small-but-consistent shapes: batch=2, channels must be 2048, spatial=4x4.
    N, H, W = 2, 4, 4
    features = jax.random.normal(k1, (N, C_IN, H, W), dtype=jnp.float32)

    # Deterministic parameter init (nn.Linear-style uniform(-1/sqrt(fan_in), ...)).
    bound = 1.0 / jnp.sqrt(jnp.float32(C_IN))
    weight = jax.random.uniform(k2, (C_OUT, C_IN), jnp.float32, -bound, bound)
    bias = jax.random.uniform(k3, (C_OUT,), jnp.float32, -bound, bound)

    out = embeder_forward(features, weight, bias)
    out = jax.block_until_ready(out)

    # Pure-JAX reference for sanity.
    ref = jnp.mean(features, axis=(2, 3)) @ weight.T + bias
    assert out.shape == (N, C_OUT)
    assert jnp.allclose(out, ref, atol=1e-4, rtol=1e-4)

    print("KERNEL_OK")
</pallas_src>

<mosaic_0001>
module attributes {stable_mosaic.version = 11 : i64} {
  func.func @_embeder_kernel(%arg0: i32, %arg1: memref<2x16x2048xf32, #tpu.memory_space<vmem>>, %arg2: memref<2048x256xf32, #tpu.memory_space<vmem>>, %arg3: memref<1x256xf32, #tpu.memory_space<vmem>>, %arg4: memref<2x256xf32, #tpu.memory_space<vmem>>) attributes {dimension_semantics = [#tpu.dimension_semantics<parallel>], iteration_bounds = array<i64: 1>, scalar_prefetch = 0 : i64, scratch_operands = 0 : i64, tpu.core_type = #tpu.core_type<tc>, window_params = [{transform_indices = @transform_0, window_bounds = array<i64: 2, 16, 2048>}, {pipeline_mode = #tpu.pipeline_mode<synchronous>, transform_indices = @transform_1, window_bounds = array<i64: 2048, 256>}, {pipeline_mode = #tpu.pipeline_mode<synchronous>, transform_indices = @transform_2, window_bounds = array<i64: 1, 256>}, {transform_indices = @transform_3, window_bounds = array<i64: 2, 256>}]} {
    %c0 = arith.constant 0 : index
    %c0_0 = arith.constant 0 : index
    %c0_1 = arith.constant 0 : index
    %0 = vector.load %arg1[%c0, %c0_0, %c0_1] : memref<2x16x2048xf32, #tpu.memory_space<vmem>>, vector<2x16x2048xf32>
    %cst = arith.constant dense<0.000000e+00> : vector<2x2048xf32>
    %1 = vector.multi_reduction <add>, %0, %cst [1] : vector<2x16x2048xf32> to vector<2x2048xf32>
    %c0_2 = arith.constant 0 : index
    %c0_3 = arith.constant 0 : index
    %2 = vector.load %arg2[%c0_2, %c0_3] : memref<2048x256xf32, #tpu.memory_space<vmem>>, vector<2048x256xf32>
    %cst_4 = arith.constant dense<0.000000e+00> : vector<2x256xf32>
    %3 = tpu.matmul %1, %2, %cst_4 {dimension_numbers = #tpu.dot_dimension_numbers<[1], [0], [0], [1], [0, 0, 1, 1], [], []>} : vector<2x2048xf32>, vector<2048x256xf32>, vector<2x256xf32> -> vector<2x256xf32>
    %c0_5 = arith.constant 0 : index
    %c0_6 = arith.constant 0 : index
    %4 = vector.load %arg3[%c0_5, %c0_6] : memref<1x256xf32, #tpu.memory_space<vmem>>, vector<1x256xf32>
    %5 = vector.broadcast %4 : vector<1x256xf32> to vector<2x256xf32>
    %6 = arith.addf %3, %5 : vector<2x256xf32>
    %c0_7 = arith.constant 0 : index
    %c0_8 = arith.constant 0 : index
    %7 = vector.load %arg4[%c0_7, %c0_8] : memref<2x256xf32, #tpu.memory_space<vmem>>, vector<2x256xf32>
    tpu.vector_store %arg4[%c0_7, %c0_8], %6 {strides = array<i32>} : memref<2x256xf32, #tpu.memory_space<vmem>>, vector<2x256xf32>,
    return
  }
  func.func @transform_0(%arg0: i32) -> (i32, i32, i32) {
    %c0_i32 = arith.constant 0 : i32
    %c0_i32_0 = arith.constant 0 : i32
    %c0_i32_1 = arith.constant 0 : i32
    return %arg0, %c0_i32, %c0_i32_0 : i32, i32, i32
  }
  func.func @transform_1(%arg0: i32) -> (i32, i32) {
    %c0_i32 = arith.constant 0 : i32
    %c0_i32_0 = arith.constant 0 : i32
    %c0_i32_1 = arith.constant 0 : i32
    return %c0_i32, %c0_i32_0 : i32, i32
  }
  func.func @transform_2(%arg0: i32) -> (i32, i32) {
    %c0_i32 = arith.constant 0 : i32
    %c0_i32_0 = arith.constant 0 : i32
    %c0_i32_1 = arith.constant 0 : i32
    return %c0_i32, %c0_i32_0 : i32, i32
  }
  func.func @transform_3(%arg0: i32) -> (i32, i32) {
    %c0_i32 = arith.constant 0 : i32
    %c0_i32_0 = arith.constant 0 : i32
    return %arg0, %c0_i32 : i32, i32
  }
}

</mosaic_0001>

<bundles_post_ra>
// kernel: tpu_custom_call.1
= control target key start
LH: loop header
LB: loop body
LE: loop exit
PB: predicated region body
PF: predicated region fallthrough
CT: control target
= control target key end

     0   :  { %8 = vsyncpa [#allocation3], 0  ;;  %s2412_s0 = inlined_call_operand.hbm [shape: f32[2,16,2048], index: 0, kind: input, shape index: {}]   ;;  %s2413_s1 = inlined_call_operand.hbm [shape: f32[2048,256], index: 1, kind: input, shape index: {}]   ;;  %s2414_s2 = inlined_call_operand.hbm [shape: f32[1,256], index: 2, kind: input, shape index: {}]   ;;  %s2415_s3 = inlined_call_operand.hbm [shape: f32[2,256], index: 3, kind: output, shape index: {}]  }
   0x1   :  { %9 = vsyncpa [#allocation6], 0 }
   0x2   :  { %10 = vsyncpa [#allocation4], 0  ;;  %s2158_s12 = smov [#allocation5]   ;;  %s2064_s16 = scalar_lea.hbm %s2413_s1, 65536 }
   0x3   :  { %s28_s13 = sshll.u32 %s2158_s12, 4  ;;  %p2065_p0 = scmp.ne.s32.totalorder %s2413_s1, %s2064_s16  ;;  %s29_s13 = int_to_ptr.vmem [resolvable:$true] %s28_s13 }
   0x4   :  { %p2068_p1 = scmp.lt.u32.totalorder %s2064_s16, %s2413_s1 }
   0x6   :  { %p2070_p2 = pnand %p2068_p1, %p2065_p0 }
   0x8   :  { %2073 = shalt.err (!%p2070_p2)
}
   0x9   :  { %s2074_s21 = scalar_lea.vmem %s29_s13, 65536  ;;  %p2079_p4 = scmp.lt.s32.totalorder %s29_s13, %s29_s13 }
   0xa   :  { %p2075_p3 = scmp.ne.s32.totalorder %s29_s13, %s2074_s21  ;;  %p2080_p5 = scmp.lt.s32.totalorder %s2074_s21, %s2074_s21 }
   0xc   :  { %p2081_p6 = por %p2080_p5, %p2079_p4 }
   0xe   :  { %p2082_p7 = pnand %p2081_p6, %p2075_p3 }
  0x10   :  { %2085 = shalt.err (!%p2082_p7)
}
  0x11   :  { %s2159_s22 = smov 256   ;;  %s2160_s23 = smov 16  }
  0x12   :  { %34 = dma.hbm_to_vmem [thread:$0]  %s2413_s1, 65536, %s29_s13, [#allocation6], %s2159_s22, %s2159_s22, %s2160_s23  }
  0x13   :  { %s2161_s26 = smov [#allocation2]   ;;  %s2086_s30 = scalar_lea.hbm %s2412_s0, 8192 }
  0x14   :  { %s16_s27 = sshll.u32 %s2161_s26, 4  ;;  %p2087_p8 = scmp.ne.s32.totalorder %s2412_s0, %s2086_s30  ;;  %s17_s27 = int_to_ptr.vmem [resolvable:$true] %s16_s27 }
  0x15   :  { %p2090_p9 = scmp.lt.u32.totalorder %s2086_s30, %s2412_s0 }
  0x17   :  { %p2092_p10 = pnand %p2090_p9, %p2087_p8 }
  0x19   :  { %2095 = shalt.err (!%p2092_p10)
}
  0x1a   :  { %s2096_s8 = scalar_lea.vmem %s17_s27, 8192  ;;  %p2101_p12 = scmp.lt.s32.totalorder %s17_s27, %s17_s27 }
  0x1b   :  { %p2097_p11 = scmp.ne.s32.totalorder %s17_s27, %s2096_s8  ;;  %p2102_p13 = scmp.lt.s32.totalorder %s2096_s8, %s2096_s8 }
  0x1d   :  { %p2103_p0 = por %p2102_p13, %p2101_p12 }
  0x1f   :  { %p2104_p1 = pnand %p2103_p0, %p2097_p11 }
  0x21   :  { %2107 = shalt.err (!%p2104_p1)
}
  0x22   :  { %s2162_s1 = smov 2048   ;;  %s2163_s9 = smov 128  }
  0x23   :  { %22 = dma.hbm_to_vmem [thread:$0]  %s2412_s0, 8192, %s17_s27, [#allocation3], %s2162_s1, %s2162_s1, %s2163_s9  }
  0x24   :  { %s2164_s12 = smov [#allocation7]   ;;  %s2108_s16 = scalar_lea.hbm %s2414_s2, 32 }
  0x25   :  { %s41_s13 = sshll.u32 %s2164_s12, 4  ;;  %p2109_p2 = scmp.ne.s32.totalorder %s2414_s2, %s2108_s16  ;;  %s42_s13 = int_to_ptr.vmem [resolvable:$true] %s41_s13 }
  0x26   :  { %p2112_p3 = scmp.lt.u32.totalorder %s2108_s16, %s2414_s2 }
  0x28   :  { %p2114_p4 = pnand %p2112_p3, %p2109_p2 }
  0x2a   :  { %2117 = shalt.err (!%p2114_p4)
}
  0x2b   :  { %s2118_s21 = scalar_lea.vmem %s42_s13, 32  ;;  %p2123_p6 = scmp.lt.s32.totalorder %s42_s13, %s42_s13 }
  0x2c   :  { %p2119_p5 = scmp.ne.s32.totalorder %s42_s13, %s2118_s21  ;;  %p2124_p7 = scmp.lt.s32.totalorder %s2118_s21, %s2118_s21 }
  0x2e   :  { %p2125_p8 = por %p2124_p7, %p2123_p6 }
  0x30   :  { %p2126_p9 = pnand %p2125_p8, %p2119_p5 }
  0x32   :  { %2129 = shalt.err (!%p2126_p9)
}
  0x33   :  { %44 = dma.hbm_to_vmem [thread:$0]  %s2414_s2, 32, %s42_s13, [#allocation6]  }
  0x34   :  { %2152 = dma.done.wait [#allocation3], 8192  }
  0x35   :  { %2153 = vsyncadd [#allocation3], 4294959104 }
  0x36   :  { %2154 = dma.done.wait [#allocation6], 65568  }
  0x37   :  { %2155 = vsyncadd [#allocation6], 4294901728  ;;  %v343_v0 = vld [vmem:[#allocation5 + $0x8] sm:$0xff]  ;;  %v345_v1 = vld [vmem:[#allocation5 + $0x18] sm:$0xff]  ;;  %vm898_vm0 = vcmask 1041409   ;;  %s2165_s2 = smov [#allocation8]  }
  0x38   :  { %v599_v2 = vld [vmem:[#allocation5 + $0x808] sm:$0xff]  ;;  %v1528_v3 = vpack.c.bf16 %v345_v1, %v343_v0  ;;  %v601_v4 = vld [vmem:[#allocation5 + $0x818] sm:$0xff]  ;;  %v342_v5 = vld [vmem:[#allocation5] sm:$0xff]  ;;  %s1517_s23 = sshll.u32 %s2165_s2, 4  ;;  %s1518_s23 = int_to_ptr.vmem [resolvable:$true] %s1517_s23 }
  0x39   :  { %v344_v6 = vld [vmem:[#allocation5 + $0x10] sm:$0xff]  ;;  %v1784_v7 = vpack.c.bf16 %v601_v4, %v599_v2  ;;  %v598_v9 = vld [vmem:[#allocation5 + $0x800] sm:$0xff]  ;;  %v347_v11 = vld [vmem:[#allocation5 + $0x28] sm:$0xff]  ;;  %s2130_s24 = scalar_lea.vmem %s1518_s23, 64  ;;  %p2135_p11 = scmp.lt.s32.totalorder %s1518_s23, %s1518_s23 }
  0x3a   :  { %v1530_v8 = vpack.c.bf16 %v344_v6, %v342_v5  ;;  %v600_v10 = vld [vmem:[#allocation5 + $0x810] sm:$0xff]  ;;  %1529 = vmatprep.subr.bf16.mxu1 %v1528_v3  ;;  %v349_v13 = vld [vmem:[#allocation5 + $0x38] sm:$0xff]  ;;  %v603_v14 = vld [vmem:[#allocation5 + $0x828] sm:$0xff]  ;;  %p2131_p10 = scmp.ne.s32.totalorder %s1518_s23, %s2130_s24  ;;  %p2136_p12 = scmp.lt.s32.totalorder %s2130_s24, %s2130_s24 }
  0x3b   :  { %v1786_v12 = vpack.c.bf16 %v600_v10, %v598_v9  ;;  %v605_v15 = vld [vmem:[#allocation5 + $0x838] sm:$0xff]  ;;  %1785 = vmatprep.subr.bf16.mxu0 %v1784_v7  ;;  %v1532_v16 = vpack.c.bf16 %v349_v13, %v347_v11  ;;  %v346_v18 = vld [vmem:[#allocation5 + $0x20] sm:$0xff]  ;;  %v348_v19 = vld [vmem:[#allocation5 + $0x30] sm:$0xff] }
  0x3c   :  { %1531 = vmatpush1.bf16.msra.mxu1 %v1530_v8  ;;  %v1788_v17 = vpack.c.bf16 %v605_v15, %v603_v14  ;;  %v602_v20 = vld [vmem:[#allocation5 + $0x820] sm:$0xff]  ;;  %v1534_v21 = vpack.c.bf16 %v348_v19, %v346_v18  ;;  %v604_v22 = vld [vmem:[#allocation5 + $0x830] sm:$0xff]  ;;  %v351_v23 = vld [vmem:[#allocation5 + $0x48] sm:$0xff]  ;;  %p2137_p13 = por %p2136_p12, %p2135_p11 }
  0x3d   :  { %1787 = vmatpush1.bf16.msra.mxu0 %v1786_v12  ;;  %v353_v24 = vld [vmem:[#allocation5 + $0x58] sm:$0xff]  ;;  %1533 = vmatprep.subr.bf16.mxu1 %v1532_v16  ;;  %v1790_v25 = vpack.c.bf16 %v604_v22, %v602_v20  ;;  %v607_v27 = vld [vmem:[#allocation5 + $0x848] sm:$0xff]  ;;  %v350_v29 = vld [vmem:[#allocation5 + $0x40] sm:$0xff] }
  0x3e   :  { %1789 = vmatprep.subr.bf16.mxu0 %v1788_v17  ;;  %v1536_v26 = vpack.c.bf16 %v353_v24, %v351_v23  ;;  %v609_v28 = vld [vmem:[#allocation5 + $0x858] sm:$0xff]  ;;  %v352_v31 = vld [vmem:[#allocation5 + $0x50] sm:$0xff]  ;;  %v606_v32 = vld [vmem:[#allocation5 + $0x840] sm:$0xff]  ;;  %p2138_p0 = pnand %p2137_p13, %p2131_p10 }
  0x3f   :  { %v1792_v30 = vpack.c.bf16 %v609_v28, %v607_v27  ;;  %v608_v33 = vld [vmem:[#allocation5 + $0x850] sm:$0xff]  ;;  %v1538_v34 = vpack.c.bf16 %v352_v31, %v350_v29  ;;  %v355_v35 = vld [vmem:[#allocation5 + $0x68] sm:$0xff]  ;;  %v357_v36 = vld [vmem:[#allocation5 + $0x78] sm:$0xff] }
  0x40   :  { %1535 = vmatpush1.bf16.msra.mxu1 %v1534_v21  ;;  %v611_v37 = vld [vmem:[#allocation5 + $0x868] sm:$0xff]  ;;  %v1794_v38 = vpack.c.bf16 %v608_v33, %v606_v32  ;;  %v1540_v39 = vpack.c.bf16 %v357_v36, %v355_v35  ;;  %v613_v40 = vld [vmem:[#allocation5 + $0x878] sm:$0xff]  ;;  %v354_v41 = vld [vmem:[#allocation5 + $0x60] sm:$0xff] }
  0x41   :  { %1791 = vmatpush1.bf16.msra.mxu0 %v1790_v25  ;;  %1537 = vmatprep.subr.bf16.mxu1 %v1536_v26  ;;  %v356_v42 = vld [vmem:[#allocation5 + $0x70] sm:$0xff]  ;;  %v1796_v43 = vpack.c.bf16 %v613_v40, %v611_v37  ;;  %v610_v44 = vld [vmem:[#allocation5 + $0x860] sm:$0xff]  ;;  %v359_v46 = vld [vmem:[#allocation5 + $0x88] sm:$0xff] }
  0x42   :  { %1793 = vmatprep.subr.bf16.mxu0 %v1792_v30  ;;  %v612_v45 = vld [vmem:[#allocation5 + $0x870] sm:$0xff]  ;;  %v361_v47 = vld [vmem:[#allocation5 + $0x98] sm:$0xff]  ;;  %v615_v48 = vld [vmem:[#allocation5 + $0x888] sm:$0xff]  ;;  %v1542_v50 = vpack.c.bf16 %v356_v42, %v354_v41 }
  0x43   :  { %v617_v49 = vld [vmem:[#allocation5 + $0x898] sm:$0xff]  ;;  %v1798_v51 = vpack.c.bf16 %v612_v45, %v610_v44  ;;  %v1544_v52 = vpack.c.bf16 %v361_v47, %v359_v46  ;;  %v358_v53 = vld [vmem:[#allocation5 + $0x80] sm:$0xff]  ;;  %v360_v54 = vld [vmem:[#allocation5 + $0x90] sm:$0xff] }
  0x44   :  { %1539 = vmatpush1.bf16.msra.mxu1 %v1538_v34  ;;  %v614_v55 = vld [vmem:[#allocation5 + $0x880] sm:$0xff]  ;;  %v1800_v56 = vpack.c.bf16 %v617_v49, %v615_v48  ;;  %v616_v57 = vld [vmem:[#allocation5 + $0x890] sm:$0xff]  ;;  %v363_v58 = vld [vmem:[#allocation5 + $0xa8] sm:$0xff]  ;;  %v1546_v62 = vpack.c.bf16 %v360_v54, %v358_v53 }
  0x45   :  { %1795 = vmatpush1.bf16.msra.mxu0 %v1794_v38  ;;  %1541 = vmatprep.subr.bf16.mxu1 %v1540_v39  ;;  %v365_v59 = vld [vmem:[#allocation5 + $0xb8] sm:$0xff]  ;;  %v619_v60 = vld [vmem:[#allocation5 + $0x8a8] sm:$0xff]  ;;  %v1802_v63 = vpack.c.bf16 %v616_v57, %v614_v55  ;;  %v362_v1 = vld [vmem:[#allocation5 + $0xa0] sm:$0xff] }
  0x46   :  { %1797 = vmatprep.subr.bf16.mxu0 %v1796_v43  ;;  %v621_v61 = vld [vmem:[#allocation5 + $0x8b8] sm:$0xff]  ;;  %v1548_v0 = vpack.c.bf16 %v365_v59, %v363_v58  ;;  %v364_v2 = vld [vmem:[#allocation5 + $0xb0] sm:$0xff]  ;;  %v618_v3 = vld [vmem:[#allocation5 + $0x8a0] sm:$0xff] }
  0x47   :  { %v1804_v4 = vpack.c.bf16 %v621_v61, %v619_v60  ;;  %v620_v5 = vld [vmem:[#allocation5 + $0x8b0] sm:$0xff]  ;;  %v367_v6 = vld [vmem:[#allocation5 + $0xc8] sm:$0xff]  ;;  %v369_v7 = vld [vmem:[#allocation5 + $0xd8] sm:$0xff]  ;;  %v1550_v10 = vpack.c.bf16 %v364_v2, %v362_v1 }
  0x48   :  { %1543 = vmatpush1.bf16.msra.mxu1 %v1542_v50  ;;  %v623_v8 = vld [vmem:[#allocation5 + $0x8c8] sm:$0xff]  ;;  %v625_v9 = vld [vmem:[#allocation5 + $0x8d8] sm:$0xff]  ;;  %v1806_v11 = vpack.c.bf16 %v620_v5, %v618_v3  ;;  %v1552_v12 = vpack.c.bf16 %v369_v7, %v367_v6  ;;  %v366_v13 = vld [vmem:[#allocation5 + $0xc0] sm:$0xff] }
  0x49   :  { %1799 = vmatpush1.bf16.msra.mxu0 %v1798_v51  ;;  %1545 = vmatprep.subr.bf16.mxu1 %v1544_v52  ;;  %v368_v14 = vld [vmem:[#allocation5 + $0xd0] sm:$0xff]  ;;  %v622_v15 = vld [vmem:[#allocation5 + $0x8c0] sm:$0xff]  ;;  %v1808_v16 = vpack.c.bf16 %v625_v9, %v623_v8  ;;  %v371_v18 = vld [vmem:[#allocation5 + $0xe8] sm:$0xff] }
  0x4a   :  { %1801 = vmatprep.subr.bf16.mxu0 %v1800_v56  ;;  %v624_v17 = vld [vmem:[#allocation5 + $0x8d0] sm:$0xff]  ;;  %v373_v19 = vld [vmem:[#allocation5 + $0xf8] sm:$0xff]  ;;  %v627_v20 = vld [vmem:[#allocation5 + $0x8e8] sm:$0xff]  ;;  %v1554_v22 = vpack.c.bf16 %v368_v14, %v366_v13 }
  0x4b   :  { %v629_v21 = vld [vmem:[#allocation5 + $0x8f8] sm:$0xff]  ;;  %v1810_v23 = vpack.c.bf16 %v624_v17, %v622_v15  ;;  %v1556_v24 = vpack.c.bf16 %v373_v19, %v371_v18  ;;  %v370_v25 = vld [vmem:[#allocation5 + $0xe0] sm:$0xff]  ;;  %v372_v26 = vld [vmem:[#allocation5 + $0xf0] sm:$0xff] }
  0x4c   :  { %1547 = vmatpush1.bf16.msra.mxu1 %v1546_v62  ;;  %v626_v27 = vld [vmem:[#allocation5 + $0x8e0] sm:$0xff]  ;;  %v1812_v28 = vpack.c.bf16 %v629_v21, %v627_v20  ;;  %v628_v29 = vld [vmem:[#allocation5 + $0x8f0] sm:$0xff]  ;;  %v375_v30 = vld [vmem:[#allocation5 + $0x108] sm:$0xff]  ;;  %v1558_v34 = vpack.c.bf16 %v372_v26, %v370_v25 }
  0x4d   :  { %1803 = vmatpush1.bf16.msra.mxu0 %v1802_v63  ;;  %1549 = vmatprep.subr.bf16.mxu1 %v1548_v0  ;;  %v377_v31 = vld [vmem:[#allocation5 + $0x118] sm:$0xff]  ;;  %v631_v32 = vld [vmem:[#allocation5 + $0x908] sm:$0xff]  ;;  %v1814_v35 = vpack.c.bf16 %v628_v29, %v626_v27  ;;  %v374_v37 = vld [vmem:[#allocation5 + $0x100] sm:$0xff] }
  0x4e   :  { %1805 = vmatprep.subr.bf16.mxu0 %v1804_v4  ;;  %v633_v33 = vld [vmem:[#allocation5 + $0x918] sm:$0xff]  ;;  %v1560_v36 = vpack.c.bf16 %v377_v31, %v375_v30  ;;  %v376_v38 = vld [vmem:[#allocation5 + $0x110] sm:$0xff]  ;;  %v630_v39 = vld [vmem:[#allocation5 + $0x900] sm:$0xff] }
  0x4f   :  { %v1816_v40 = vpack.c.bf16 %v633_v33, %v631_v32  ;;  %v632_v41 = vld [vmem:[#allocation5 + $0x910] sm:$0xff]  ;;  %v379_v42 = vld [vmem:[#allocation5 + $0x128] sm:$0xff]  ;;  %v381_v43 = vld [vmem:[#allocation5 + $0x138] sm:$0xff]  ;;  %v1562_v46 = vpack.c.bf16 %v376_v38, %v374_v37 }
  0x50   :  { %1551 = vmatpush1.bf16.msra.mxu1 %v1550_v10  ;;  %v635_v44 = vld [vmem:[#allocation5 + $0x928] sm:$0xff]  ;;  %v637_v45 = vld [vmem:[#allocation5 + $0x938] sm:$0xff]  ;;  %v378_v47 = vld [vmem:[#allocation5 + $0x120] sm:$0xff]  ;;  %v1818_v48 = vpack.c.bf16 %v632_v41, %v630_v39  ;;  %v1564_v49 = vpack.c.bf16 %v381_v43, %v379_v42 }
  0x51   :  { %1807 = vmatpush1.bf16.msra.mxu0 %v1806_v11  ;;  %1553 = vmatprep.subr.bf16.mxu1 %v1552_v12  ;;  %v380_v50 = vld [vmem:[#allocation5 + $0x130] sm:$0xff]  ;;  %v634_v51 = vld [vmem:[#allocation5 + $0x920] sm:$0xff]  ;;  %v1820_v53 = vpack.c.bf16 %v637_v45, %v635_v44  ;;  %v383_v54 = vld [vmem:[#allocation5 + $0x148] sm:$0xff] }
  0x52   :  { %1809 = vmatprep.subr.bf16.mxu0 %v1808_v16  ;;  %v636_v52 = vld [vmem:[#allocation5 + $0x930] sm:$0xff]  ;;  %v385_v55 = vld [vmem:[#allocation5 + $0x158] sm:$0xff]  ;;  %v639_v56 = vld [vmem:[#allocation5 + $0x948] sm:$0xff]  ;;  %v1566_v60 = vpack.c.bf16 %v380_v50, %v378_v47 }
  0x53   :  { %v641_v57 = vld [vmem:[#allocation5 + $0x958] sm:$0xff]  ;;  %v382_v58 = vld [vmem:[#allocation5 + $0x140] sm:$0xff]  ;;  %v384_v59 = vld [vmem:[#allocation5 + $0x150] sm:$0xff]  ;;  %v1822_v1 = vpack.c.bf16 %v636_v52, %v634_v51  ;;  %v1568_v2 = vpack.c.bf16 %v385_v55, %v383_v54 }
  0x54   :  { %1555 = vmatpush1.bf16.msra.mxu1 %v1554_v22  ;;  %v2222_v61 = vld [vmem:[#allocation5 + $0x940] sm:$0xff]  ;;  %v640_v62 = vld [vmem:[#allocation5 + $0x950] sm:$0xff]  ;;  %v387_v63 = vld [vmem:[#allocation5 + $0x168] sm:$0xff]  ;;  %v1824_v7 = vpack.c.bf16 %v641_v57, %v639_v56  ;;  %v1570_v20 = vpack.c.bf16 %v384_v59, %v382_v58 }
  0x55   :  { %1811 = vmatpush1.bf16.msra.mxu0 %v1810_v23  ;;  %1557 = vmatprep.subr.bf16.mxu1 %v1556_v24  ;;  %v389_v0 = vld [vmem:[#allocation5 + $0x178] sm:$0xff]  ;;  %v2224_v3 = vld [vmem:[#allocation5 + $0x968] sm:$0xff]  ;;  %v2226_v5 = vld [vmem:[#allocation5 + $0x160] sm:$0xff]  ;;  %v1826_v24 = vpack.c.bf16 %v640_v62, %v2222_v61 }
  0x56   :  { %1813 = vmatprep.subr.bf16.mxu0 %v1812_v28  ;;  %v645_v4 = vld [vmem:[#allocation5 + $0x978] sm:$0xff]  ;;  %v2228_v6 = vld [vmem:[#allocation5 + $0x170] sm:$0xff]  ;;  %v2230_v8 = vld [vmem:[#allocation5 + $0x960] sm:$0xff]  ;;  %v1572_v25 = vpack.c.bf16 %v389_v0, %v387_v63 }
  0x57   :  { %v2232_v9 = vld [vmem:[#allocation5 + $0x970] sm:$0xff]  ;;  %v2234_v10 = vld [vmem:[#allocation5 + $0x188] sm:$0xff]  ;;  %v2236_v11 = vld [vmem:[#allocation5 + $0x198] sm:$0xff]  ;;  %v1828_v29 = vpack.c.bf16 %v645_v4, %v2224_v3  ;;  %v1574_v30 = vpack.c.bf16 %v2228_v6, %v2226_v5 }
  0x58   :  { %1559 = vmatpush1.bf16.msra.mxu1 %v1558_v34  ;;  %v2238_v12 = vld [vmem:[#allocation5 + $0x988] sm:$0xff]  ;;  %v2240_v13 = vld [vmem:[#allocation5 + $0x998] sm:$0xff]  ;;  %v2242_v14 = vld [vmem:[#allocation5 + $0x180] sm:$0xff]  ;;  %v1830_v38 = vpack.c.bf16 %v2232_v9, %v2230_v8  ;;  %v1576_v39 = vpack.c.bf16 %v2236_v11, %v2234_v10 }
  0x59   :  { %1815 = vmatpush1.bf16.msra.mxu0 %v1814_v35  ;;  %1561 = vmatprep.subr.bf16.mxu1 %v1560_v36  ;;  %v2244_v15 = vld [vmem:[#allocation5 + $0x190] sm:$0xff]  ;;  %v2246_v16 = vld [vmem:[#allocation5 + $0x980] sm:$0xff]  ;;  %v2250_v18 = vld [vmem:[#allocation5 + $0x1a8] sm:$0xff] }
  0x5a   :  { %1817 = vmatprep.subr.bf16.mxu0 %v1816_v40  ;;  %v2248_v17 = vld [vmem:[#allocation5 + $0x990] sm:$0xff]  ;;  %v2252_v19 = vld [vmem:[#allocation5 + $0x1b8] sm:$0xff]  ;;  %v2254_v21 = vld [vmem:[#allocation5 + $0x9a8] sm:$0xff]  ;;  %v1832_v40 = vpack.c.bf16 %v2240_v13, %v2238_v12  ;;  %v1578_v41 = vpack.c.bf16 %v2244_v15, %v2242_v14 }
  0x5b   :  { %v2256_v22 = vld [vmem:[#allocation5 + $0x9b8] sm:$0xff]  ;;  %v2258_v23 = vld [vmem:[#allocation5 + $0x1a0] sm:$0xff]  ;;  %v2261_v26 = vld [vmem:[#allocation5 + $0x1b0] sm:$0xff]  ;;  %v1834_v45 = vpack.c.bf16 %v2248_v17, %v2246_v16 }
  0x5c   :  { %1563 = vmatpush1.bf16.msra.mxu1 %v1562_v46  ;;  %v2263_v27 = vld [vmem:[#allocation5 + $0x9a0] sm:$0xff]  ;;  %v2265_v28 = vld [vmem:[#allocation5 + $0x9b0] sm:$0xff]  ;;  %v2270_v31 = vld [vmem:[#allocation5 + $0x1c8] sm:$0xff]  ;;  %v1580_v46 = vpack.c.bf16 %v2252_v19, %v2250_v18  ;;  %v1836_v52 = vpack.c.bf16 %v2256_v22, %v2254_v21 }
  0x5d   :  { %1819 = vmatpush1.bf16.msra.mxu0 %v1818_v48  ;;  %1565 = vmatprep.subr.bf16.mxu1 %v1564_v49  ;;  %v2272_v32 = vld [vmem:[#allocation5 + $0x1d8] sm:$0xff]  ;;  %v2274_v33 = vld [vmem:[#allocation5 + $0x9c8] sm:$0xff]  ;;  %v2278_v35 = vld [vmem:[#allocation5 + $0x1c0] sm:$0xff]  ;;  %v1838_v54 = vpack.c.bf16 %v2265_v28, %v2263_v27 }
  0x5e   :  { %1821 = vmatprep.subr.bf16.mxu0 %v1820_v53  ;;  %v2276_v34 = vld [vmem:[#allocation5 + $0x9d8] sm:$0xff]  ;;  %v2280_v36 = vld [vmem:[#allocation5 + $0x1d0] sm:$0xff]  ;;  %v55_v37 = vld [vmem:[#allocation2 + $0x8] sm:$0xff]  ;;  %v1582_v53 = vpack.c.bf16 %v2261_v26, %v2258_v23 }
  0x5f   :  { %v71_v42 = vld [vmem:[#allocation2 + $0x88] sm:$0xff]  ;;  %v2294_v47 = vld [vmem:[#allocation5 + $0x9c0] sm:$0xff]  ;;  %v2296_v48 = vld [vmem:[#allocation5 + $0x9d0] sm:$0xff]  ;;  %v1586_v3 = vpack.c.bf16 %v2280_v36, %v2278_v35 }
  0x60   :  { %1567 = vmatpush1.bf16.msra.mxu1 %v1566_v60  ;;  %v87_v43 = vld [vmem:[#allocation2 + $0x108] sm:$0xff]  ;;  %v125_v49 = vadd.f32 %v71_v42, %v55_v37  ;;  %v2306_v59 = vld [vmem:[#allocation5 + $0x1f8] sm:$0xff]  ;;  %v54_v0 = vld [vmem:[#allocation2] sm:$0xff]  ;;  %v1842_v4 = vpack.c.bf16 %v2296_v48, %v2294_v47 }
  0x61   :  { %1823 = vmatpush1.bf16.msra.mxu0 %v1822_v1  ;;  %1569 = vmatprep.subr.bf16.mxu1 %v1568_v2  ;;  %v103_v44 = vld [vmem:[#allocation2 + $0x188] sm:$0xff]  ;;  %v1584_v1 = vpack.c.bf16 %v2272_v32, %v2270_v31  ;;  %v1840_v2 = vpack.c.bf16 %v2276_v34, %v2274_v33  ;;  %v70_v5 = vld [vmem:[#allocation2 + $0x80] sm:$0xff]  ;;  %v665_v28 = vld [vmem:[#allocation5 + $0xa18] sm:$0xff] }
  0x62   :  { %1825 = vmatprep.subr.bf16.mxu0 %v1824_v7  ;;  %v237_v50 = vadd.f32 %v103_v44, %v87_v43  ;;  %v63_v51 = vld [vmem:[#allocation2 + $0x48] sm:$0xff]  ;;  %v126_v60 = vrot.slane %v125_v49, 4  ;;  %v86_v6 = vld [vmem:[#allocation2 + $0x100] sm:$0xff]  ;;  %v118_v14 = vadd.f32 %v70_v5, %v54_v0 }
  0x63   :  { %v79_v55 = vld [vmem:[#allocation2 + $0xc8] sm:$0xff]  ;;  %v102_v7 = vld [vmem:[#allocation2 + $0x180] sm:$0xff] }
  0x64   :  { %1571 = vmatpush1.bf16.msra.mxu1 %v1570_v20  ;;  %v95_v56 = vld [vmem:[#allocation2 + $0x148] sm:$0xff]  ;;  %v238_v61 = vrot.slane %v237_v50, 4  ;;  %v181_v62 = vadd.f32 %v79_v55, %v63_v51  ;;  %v127_v8 = vadd.f32 %v126_v60, %v125_v49  ;;  %v62_v12 = vld [vmem:[#allocation2 + $0x40] sm:$0xff]  ;;  %v230_v15 = vadd.f32 %v102_v7, %v86_v6  ;;  %v660_v6 = vld [vmem:[#allocation5 + $0x9f0] sm:$0xff] }
  0x65   :  { %1827 = vmatpush1.bf16.msra.mxu0 %v1826_v24  ;;  %1573 = vmatprep.subr.bf16.mxu1 %v1572_v25  ;;  %v111_v57 = vld [vmem:[#allocation2 + $0x1c8] sm:$0xff]  ;;  %v78_v16 = vld [vmem:[#allocation2 + $0xc0] sm:$0xff]  ;;  %v119_v24 = vrot.slane %v118_v14, 4 }
  0x66   :  { %1829 = vmatprep.subr.bf16.mxu0 %v1828_v29  ;;  %v2304_v58 = vld [vmem:[#allocation5 + $0x1e8] sm:$0xff]  ;;  %v293_v63 = vadd.f32 %v111_v57, %v95_v56  ;;  %v239_v9 = vadd.f32 %v238_v61, %v237_v50  ;;  %v182_v10 = vrot.slane %v181_v62, 4  ;;  %v94_v17 = vld [vmem:[#allocation2 + $0x140] sm:$0xff]  ;;  %v128_v19 = vrot.slane %v127_v8, 2  ;;  %v661_v56 = vld [vmem:[#allocation5 + $0x9f8] sm:$0xff] }
  0x67   :  { %v1588_v13 = vpack.c.bf16 %v2306_v59, %v2304_v58  ;;  %v110_v18 = vld [vmem:[#allocation2 + $0x1c0] sm:$0xff]  ;;  %v231_v25 = vrot.slane %v230_v15, 4  ;;  %v174_v29 = vadd.f32 %v78_v16, %v62_v12  ;;  %v659_v55 = vld [vmem:[#allocation5 + $0x9e8] sm:$0xff] }
  0x68   :  { %1575 = vmatpush1.bf16.msra.mxu1 %v1574_v30  ;;  %v294_v11 = vrot.slane %v293_v63, 4  ;;  %v240_v20 = vrot.slane %v239_v9, 2  ;;  %v183_v21 = vadd.f32 %v182_v10, %v181_v62  ;;  %v286_v30 = vadd.f32 %v110_v18, %v94_v17  ;;  %v658_v62 = vld [vmem:[#allocation5 + $0x9e0] sm:$0xff]  ;;  %v407_v7 = vld [vmem:[#allocation5 + $0x208] sm:$0xff] }
  0x69   :  { %1831 = vmatpush1.bf16.msra.mxu0 %v1830_v38  ;;  %1577 = vmatprep.subr.bf16.mxu1 %v1576_v39  ;;  %v129_v31 = vadd.f32 %v128_v19, %v127_v8  ;;  %v120_v39 = vadd.f32 %v119_v24, %v118_v14  ;;  %v232_v42 = vadd.f32 %v231_v25, %v230_v15  ;;  %v175_v43 = vrot.slane %v174_v29, 4  ;;  %v409_v8 = vld [vmem:[#allocation5 + $0x218] sm:$0xff]  ;;  %v663_v27 = vld [vmem:[#allocation5 + $0xa08] sm:$0xff]  ;;  %v662_v36 = vld [vmem:[#allocation5 + $0xa00] sm:$0xff] }
  0x6a   :  { %1833 = vmatprep.subr.bf16.mxu0 %v1832_v40  ;;  %v295_v22 = vadd.f32 %v294_v11, %v293_v63  ;;  %v241_v32 = vadd.f32 %v240_v20, %v239_v9  ;;  %v184_v37 = vrot.slane %v183_v21, 2  ;;  %v287_v44 = vrot.slane %v286_v30, 4  ;;  %v406_v20 = vld [vmem:[#allocation5 + $0x200] sm:$0xff]  ;;  %v664_v24 = vld [vmem:[#allocation5 + $0xa10] sm:$0xff]  ;;  %v411_v25 = vld [vmem:[#allocation5 + $0x228] sm:$0xff] }
  0x6b   :  { %v130_v40 = vrot.slane %v129_v31, 1  ;;  %v121_v57 = vrot.slane %v120_v39, 2  ;;  %v233_v60 = vrot.slane %v232_v42, 2  ;;  %v1844_v26 = vpack.c.bf16 %v661_v56, %v659_v55  ;;  %v667_v48 = vld [vmem:[#allocation5 + $0xa28] sm:$0xff] }
  0x6c   :  { %1579 = vmatpush1.bf16.msra.mxu1 %v1578_v41  ;;  %v296_v38 = vrot.slane %v295_v22, 2  ;;  %v242_v49 = vrot.slane %v241_v32, 1  ;;  %v185_v50 = vadd.f32 %v184_v37, %v183_v21  ;;  %v176_v41 = vadd.f32 %v175_v43, %v174_v29  ;;  %v408_v21 = vld [vmem:[#allocation5 + $0x210] sm:$0xff]  ;;  %v413_v29 = vld [vmem:[#allocation5 + $0x238] sm:$0xff]  ;;  %v410_v37 = vld [vmem:[#allocation5 + $0x220] sm:$0xff] }
  0x6d   :  { %1835 = vmatpush1.bf16.msra.mxu0 %v1834_v45  ;;  %1581 = vmatprep.subr.bf16.mxu1 %v1580_v46  ;;  %v288_v61 = vadd.f32 %v287_v44, %v286_v30  ;;  %v402_v45 = vld [vmem:[#allocation5 + $0x1e0] sm:$0xff]  ;;  %v404_v46 = vld [vmem:[#allocation5 + $0x1f0] sm:$0xff]  ;;  %v131_v63 = vadd.f32 %v130_v40, %v129_v31  ;;  %v122_v9 = vadd.f32 %v121_v57, %v120_v39  ;;  %v415_v44 = vld [vmem:[#allocation5 + $0x248] sm:$0xff] }
  0x6e   :  { %1837 = vmatprep.subr.bf16.mxu0 %v1836_v52  ;;  %v297_v51 = vadd.f32 %v296_v38, %v295_v22  ;;  %v243_v0 = vadd.f32 %v242_v49, %v241_v32  ;;  %v186_v52 = vrot.slane %v185_v50, 1  ;;  %v234_v10 = vadd.f32 %v233_v60, %v232_v42  ;;  %v412_v38 = vld [vmem:[#allocation5 + $0x230] sm:$0xff]  ;;  %v666_v39 = vld [vmem:[#allocation5 + $0xa20] sm:$0xff]  ;;  %v417_v40 = vld [vmem:[#allocation5 + $0x258] sm:$0xff] }
  0x6f   :  { %v177_v11 = vrot.slane %v176_v41, 2  ;;  %v289_v23 = vrot.slane %v288_v61, 2  ;;  %v1590_v17 = vpack.c.bf16 %v404_v46, %v402_v45  ;;  %v1846_v18 = vpack.c.bf16 %v660_v6, %v658_v62  ;;  %v668_v43 = vld [vmem:[#allocation5 + $0xa30] sm:$0xff]  ;;  %v671_v49 = vld [vmem:[#allocation5 + $0xa48] sm:$0xff]  ;;  %v414_v57 = vld [vmem:[#allocation5 + $0x240] sm:$0xff] }
  0x70   :  { %1583 = vmatpush1.bf16.msra.mxu1 %v1582_v53  ;;  %v298_v5 = vrot.slane %v297_v51, 1  ;;  %v900_v53 = vsel %vm898_vm0, %v243_v0, %v131_v63  ;;  %v187_v12 = vadd.f32 %v186_v52, %v185_v50  ;;  %v1592_v33 = vpack.c.bf16 %v409_v8, %v407_v7  ;;  %v673_v50 = vld [vmem:[#allocation5 + $0xa58] sm:$0xff]  ;;  %v416_v60 = vld [vmem:[#allocation5 + $0x250] sm:$0xff]  ;;  %v419_v46 = vld [vmem:[#allocation5 + $0x268] sm:$0xff] }
  0x71   :  { %1839 = vmatpush1.bf16.msra.mxu0 %v1838_v54  ;;  %1585 = vmatprep.subr.bf16.mxu1 %v1584_v1  ;;  %v123_v54 = vrot.slane %v122_v9, 1  ;;  %v235_v1 = vrot.slane %v234_v10, 1  ;;  %v178_v15 = vadd.f32 %v177_v11, %v176_v41  ;;  %v290_v16 = vadd.f32 %v289_v23, %v288_v61  ;;  %v670_v41 = vld [vmem:[#allocation5 + $0xa40] sm:$0xff]  ;;  %v672_v45 = vld [vmem:[#allocation5 + $0xa50] sm:$0xff]  ;;  %v421_v62 = vld [vmem:[#allocation5 + $0x278] sm:$0xff] }
  0x72   :  { %1841 = vmatprep.subr.bf16.mxu0 %v1840_v2  ;;  %v299_v14 = vadd.f32 %v298_v5, %v297_v51  ;;  %995 = vmatprep.mubr.f32.mxu1 %v900_v53  ;;  %v1594_v59 = vpack.c.bf16 %v408_v21, %v406_v20  ;;  %v1850_v31 = vpack.c.bf16 %v664_v24, %v662_v36  ;;  %v675_v63 = vld [vmem:[#allocation5 + $0xa68] sm:$0xff]  ;;  %v677_v0 = vld [vmem:[#allocation5 + $0xa78] sm:$0xff]  ;;  %v418_v7 = vld [vmem:[#allocation5 + $0x260] sm:$0xff] }
  0x73   :  { %v124_v2 = vadd.f32 %v123_v54, %v122_v9  ;;  %v236_v19 = vadd.f32 %v235_v1, %v234_v10  ;;  %v179_v22 = vrot.slane %v178_v15, 1  ;;  %v291_v35 = vrot.slane %v290_v16, 1  ;;  %v420_v8 = vld [vmem:[#allocation5 + $0x270] sm:$0xff]  ;;  %v674_v9 = vld [vmem:[#allocation5 + $0xa60] sm:$0xff]  ;;  %v423_v23 = vld [vmem:[#allocation5 + $0x288] sm:$0xff] }
  0x74   :  { %1587 = vmatpush1.bf16.msra.mxu1 %v1586_v3  ;;  %v908_v34 = vsel %vm898_vm0, %v299_v14, %v187_v12  ;;  %v1848_v3 = vpack.c.bf16 %v665_v28, %v663_v27  ;;  %v1596_v32 = vpack.c.bf16 %v413_v29, %v411_v25  ;;  %v1598_v51 = vpack.c.bf16 %v412_v38, %v410_v37  ;;  %v676_v11 = vld [vmem:[#allocation5 + $0xa70] sm:$0xff]  ;;  %v679_v53 = vld [vmem:[#allocation5 + $0xa88] sm:$0xff]  ;;  %v681_v12 = vld [vmem:[#allocation5 + $0xa98] sm:$0xff] }
  0x75   :  { %1843 = vmatpush1.bf16.msra.mxu0 %v1842_v4  ;;  %1589 = vmatprep.subr.bf16.mxu1 %v1588_v13  ;;  %v180_v30 = vadd.f32 %v179_v22, %v178_v15  ;;  %v292_v47 = vadd.f32 %v291_v35, %v290_v16  ;;  %v669_v4 = vld [vmem:[#allocation5 + $0xa38] sm:$0xff]  ;;  %v899_v58 = vsel %vm898_vm0, %v236_v19, %v124_v2  ;;  %v422_v54 = vld [vmem:[#allocation5 + $0x280] sm:$0xff]  ;;  %v424_v1 = vld [vmem:[#allocation5 + $0x290] sm:$0xff] }
  0x76   :  { %1845 = vmatprep.subr.bf16.mxu0 %v1844_v26  ;;  %1279 = vmatprep.mubr.f32.mxu0 %v908_v34  ;;  %v1852_v42 = vpack.c.bf16 %v669_v4, %v667_v48  ;;  %v1854_v55 = vpack.c.bf16 %v668_v43, %v666_v39  ;;  %v1600_v56 = vpack.c.bf16 %v417_v40, %v415_v44  ;;  %v425_v26 = vld [vmem:[#allocation5 + $0x298] sm:$0xff]  ;;  %v678_v15 = vld [vmem:[#allocation5 + $0xa80] sm:$0xff]  ;;  %v683_v34 = vld [vmem:[#allocation5 + $0xaa8] sm:$0xff] }
  0x77   :  { %v907_v13 = vsel %vm898_vm0, %v292_v47, %v180_v30  ;;  %v1856_v61 = vpack.c.bf16 %v673_v50, %v671_v49  ;;  %v1602_v52 = vpack.c.bf16 %v416_v60, %v414_v57  ;;  %v1858_v5 = vpack.c.bf16 %v672_v45, %v670_v41  ;;  %v685_v2 = vld [vmem:[#allocation5 + $0xab8] sm:$0xff]  ;;  %v426_v22 = vld [vmem:[#allocation5 + $0x2a0] sm:$0xff]  ;;  %v428_v35 = vld [vmem:[#allocation5 + $0x2b0] sm:$0xff] }
  0x78   :  { %1591 = vmatpush1.bf16.msra.mxu1 %v1590_v17  ;;  %v1604_v6 = vpack.c.bf16 %v421_v62, %v419_v46  ;;  %v1860_v10 = vpack.c.bf16 %v677_v0, %v675_v63  ;;  %v1606_v14 = vpack.c.bf16 %v420_v8, %v418_v7  ;;  %v1862_v27 = vpack.c.bf16 %v676_v11, %v674_v9  ;;  %v680_v17 = vld [vmem:[#allocation5 + $0xa90] sm:$0xff]  ;;  %v682_v36 = vld [vmem:[#allocation5 + $0xaa0] sm:$0xff]  ;;  %v431_v25 = vld [vmem:[#allocation5 + $0x2c8] sm:$0xff] }
  0x79   :  { %1847 = vmatpush1.bf16.msra.mxu0 %v1846_v18  ;;  %1593 = vmatprep.subr.bf16.mxu1 %v1592_v33  ;;  %v1608_v28 = vpack.c.bf16 %v425_v26, %v423_v23  ;;  %v1864_v16 = vpack.c.bf16 %v681_v12, %v679_v53  ;;  %v427_v18 = vld [vmem:[#allocation5 + $0x2a8] sm:$0xff]  ;;  %v429_v33 = vld [vmem:[#allocation5 + $0x2b8] sm:$0xff]  ;;  %v1610_v19 = vpack.c.bf16 %v424_v1, %v422_v54  ;;  %v684_v24 = vld [vmem:[#allocation5 + $0xab0] sm:$0xff] }
  0x7a   :  { %1849 = vmatprep.subr.bf16.mxu0 %v1848_v3  ;;  %v1866_v20 = vpack.c.bf16 %v680_v17, %v678_v15  ;;  %v1612_v21 = vpack.c.bf16 %v429_v33, %v427_v18  ;;  %v1868_v3 = vpack.c.bf16 %v685_v2, %v683_v34  ;;  %v433_v29 = vld [vmem:[#allocation5 + $0x2d8] sm:$0xff]  ;;  %v687_v30 = vld [vmem:[#allocation5 + $0xac8] sm:$0xff]  ;;  %v1614_v48 = vpack.c.bf16 %v428_v35, %v426_v22  ;;  %v430_v4 = vld [vmem:[#allocation5 + $0x2c0] sm:$0xff] }
  0x7b   :  { %996 = vmatmul.mubr.f32.vlgmr.msra.gmra.mrb[0].mxu1 %v899_v58  ;;  %v689_v47 = vld [vmem:[#allocation5 + $0xad8] sm:$0xff]  ;;  %v1870_v58 = vpack.c.bf16 %v684_v24, %v682_v36  ;;  %v435_v38 = vld [vmem:[#allocation5 + $0x2e8] sm:$0xff]  ;;  %v434_v44 = vld [vmem:[#allocation5 + $0x2e0] sm:$0xff] }
  0x7c   :  { %1595 = vmatpush1.bf16.msra.mxu1 %v1594_v59  ;;  %1280 = vmatmul.mubr.f32.vlgmr.msra.gmra.mrb[0].mxu0 %v907_v13  ;;  %v1616_v59 = vpack.c.bf16 %v433_v29, %v431_v25  ;;  %v432_v13 = vld [vmem:[#allocation5 + $0x2d0] sm:$0xff]  ;;  %v1872_v37 = vpack.c.bf16 %v689_v47, %v687_v30  ;;  %v437_v39 = vld [vmem:[#allocation5 + $0x2f8] sm:$0xff]  ;;  %v690_v50 = vld [vmem:[#allocation5 + $0xae0] sm:$0xff] }
  0x7d   :  { %1851 = vmatpush1.bf16.msra.mxu0 %v1850_v31  ;;  %1597 = vmatprep.subr.bf16.mxu1 %v1596_v32  ;;  %v686_v31 = vld [vmem:[#allocation5 + $0xac0] sm:$0xff]  ;;  %v688_v32 = vld [vmem:[#allocation5 + $0xad0] sm:$0xff]  ;;  %v693_v43 = vld [vmem:[#allocation5 + $0xaf8] sm:$0xff]  ;;  %v1618_v49 = vpack.c.bf16 %v432_v13, %v430_v4  ;;  %v1620_v57 = vpack.c.bf16 %v437_v39, %v435_v38 }
  0x7e   :  { %1853 = vmatprep.subr.bf16.mxu0 %v1852_v42  ;;  %v691_v42 = vld [vmem:[#allocation5 + $0xae8] sm:$0xff]  ;;  %v436_v40 = vld [vmem:[#allocation5 + $0x2f0] sm:$0xff]  ;;  %v441_v60 = vld [vmem:[#allocation5 + $0x318] sm:$0xff] }
  0x7f   :  { %v695_v41 = vld [vmem:[#allocation5 + $0xb08] sm:$0xff]  ;;  %v1876_v45 = vpack.c.bf16 %v693_v43, %v691_v42  ;;  %v2340_v46 = vld [vmem:[#allocation5 + $0x300] sm:$0xff]  ;;  %v2342_v62 = vld [vmem:[#allocation5 + $0x310] sm:$0xff]  ;;  %v1622_v8 = vpack.c.bf16 %v436_v40, %v434_v44 }
  0x80   :  { %1599 = vmatpush1.bf16.msra.mxu1 %v1598_v51  ;;  %v692_v51 = vld [vmem:[#allocation5 + $0xaf0] sm:$0xff]  ;;  %v2344_v63 = vld [vmem:[#allocation5 + $0xb00] sm:$0xff]  ;;  %v105_v7 = vld [vmem:[#allocation2 + $0x198] sm:$0xff] }
  0x81   :  { %1855 = vmatpush1.bf16.msra.mxu0 %v1854_v55  ;;  %1601 = vmatprep.subr.bf16.mxu1 %v1600_v56  ;;  %v439_v55 = vld [vmem:[#allocation5 + $0x308] sm:$0xff]  ;;  %v1874_v56 = vpack.c.bf16 %v688_v32, %v686_v31  ;;  %v2346_v0 = vld [vmem:[#allocation5 + $0xb10] sm:$0xff]  ;;  %v2354_v23 = vld [vmem:[#allocation5 + $0xb38] sm:$0xff] }
  0x82   :  { %1857 = vmatprep.subr.bf16.mxu0 %v1856_v61  ;;  %v697_v61 = vld [vmem:[#allocation5 + $0xb18] sm:$0xff]  ;;  %v2348_v9 = vld [vmem:[#allocation5 + $0x328] sm:$0xff]  ;;  %v2356_v26 = vld [vmem:[#allocation5 + $0x320] sm:$0xff]  ;;  %v1882_v22 = vpack.c.bf16 %v2346_v0, %v2344_v63 }
  0x83   :  { %v2352_v11 = vld [vmem:[#allocation5 + $0xb28] sm:$0xff]  ;;  %v1880_v54 = vpack.c.bf16 %v697_v61, %v695_v41  ;;  %v81_v1 = vld [vmem:[#allocation2 + $0xd8] sm:$0xff]  ;;  %v2358_v17 = vld [vmem:[#allocation5 + $0x330] sm:$0xff] }
  0x84   :  { %1603 = vmatpush1.bf16.msra.mxu1 %v1602_v52  ;;  %v57_v52 = vld [vmem:[#allocation2 + $0x18] sm:$0xff]  ;;  %v2360_v18 = vld [vmem:[#allocation5 + $0xb20] sm:$0xff]  ;;  %v2362_v33 = vld [vmem:[#allocation5 + $0xb30] sm:$0xff]  ;;  %v1630_v13 = vpack.c.bf16 %v2358_v17, %v2356_v26 }
  0x85   :  { %1859 = vmatpush1.bf16.msra.mxu0 %v1858_v5  ;;  %1605 = vmatprep.subr.bf16.mxu1 %v1604_v6  ;;  %v73_v5 = vld [vmem:[#allocation2 + $0x98] sm:$0xff]  ;;  %v2368_v35 = vld [vmem:[#allocation5 + $0x348] sm:$0xff]  ;;  %v72_v47 = vld [vmem:[#allocation2 + $0x90] sm:$0xff] }
  0x86   :  { %1861 = vmatprep.subr.bf16.mxu0 %v1860_v10  ;;  %v89_v6 = vld [vmem:[#allocation2 + $0x118] sm:$0xff]  ;;  %v139_v53 = vadd.f32 %v73_v5, %v57_v52  ;;  %v104_v4 = vld [vmem:[#allocation2 + $0x190] sm:$0xff]  ;;  %v703_v31 = vld [vmem:[#allocation5 + $0xb48] sm:$0xff] }
  0x87   :  { %v2350_v10 = vld [vmem:[#allocation5 + $0x338] sm:$0xff]  ;;  %v251_v12 = vadd.f32 %v105_v7, %v89_v6  ;;  %v80_v44 = vld [vmem:[#allocation2 + $0xd0] sm:$0xff]  ;;  %v702_v63 = vld [vmem:[#allocation5 + $0xb40] sm:$0xff] }
  0x88   :  { %1607 = vmatpush1.bf16.msra.mxu1 %v1606_v14  ;;  %v65_v14 = vld [vmem:[#allocation2 + $0x58] sm:$0xff]  ;;  %v140_v34 = vrot.slane %v139_v53, 4  ;;  %v96_v40 = vld [vmem:[#allocation2 + $0x150] sm:$0xff]  ;;  %v451_v6 = vld [vmem:[#allocation5 + $0x368] sm:$0xff] }
  0x89   :  { %1863 = vmatpush1.bf16.msra.mxu0 %v1862_v27  ;;  %1609 = vmatprep.subr.bf16.mxu1 %v1608_v28  ;;  %v1878_v27 = vpack.c.bf16 %v692_v51, %v690_v50  ;;  %v1624_v28 = vpack.c.bf16 %v441_v60, %v439_v55  ;;  %v97_v15 = vld [vmem:[#allocation2 + $0x158] sm:$0xff]  ;;  %v252_v2 = vrot.slane %v251_v12, 4  ;;  %v1886_v50 = vpack.c.bf16 %v2362_v33, %v2360_v18  ;;  %v448_v60 = vld [vmem:[#allocation5 + $0x350] sm:$0xff]  ;;  %v707_v26 = vld [vmem:[#allocation5 + $0xb68] sm:$0xff] }
  0x8a   :  { %1865 = vmatprep.subr.bf16.mxu0 %v1864_v16  ;;  %v113_v16 = vld [vmem:[#allocation2 + $0x1d8] sm:$0xff]  ;;  %v141_v24 = vadd.f32 %v140_v34, %v139_v53  ;;  %v704_v5 = vld [vmem:[#allocation5 + $0xb50] sm:$0xff]  ;;  %v706_v33 = vld [vmem:[#allocation5 + $0xb60] sm:$0xff] }
  0x8b   :  { %v2370_v36 = vld [vmem:[#allocation5 + $0x358] sm:$0xff]  ;;  %v253_v25 = vadd.f32 %v252_v2, %v251_v12  ;;  %v1890_v17 = vpack.c.bf16 %v704_v5, %v702_v63  ;;  %v708_v34 = vld [vmem:[#allocation5 + $0xb70] sm:$0xff]  ;;  %v463_v63 = vld [vmem:[#allocation5 + $0x3c8] sm:$0xff] }
  0x8c   :  { %1611 = vmatpush1.bf16.msra.mxu1 %v1610_v19  ;;  %v195_v19 = vadd.f32 %v81_v1, %v65_v14  ;;  %v705_v32 = vld [vmem:[#allocation5 + $0xb58] sm:$0xff]  ;;  %v142_v38 = vrot.slane %v141_v24, 2  ;;  %v1632_v51 = vpack.c.bf16 %v2370_v36, %v2368_v35 }
  0x8d   :  { %1867 = vmatpush1.bf16.msra.mxu0 %v1866_v20  ;;  %1613 = vmatprep.subr.bf16.mxu1 %v1612_v21  ;;  %v307_v20 = vadd.f32 %v113_v16, %v97_v15  ;;  %v1626_v21 = vpack.c.bf16 %v2342_v62, %v2340_v46  ;;  %v254_v39 = vrot.slane %v253_v25, 2  ;;  %v1888_v62 = vpack.c.bf16 %v705_v32, %v703_v31  ;;  %v453_v7 = vld [vmem:[#allocation5 + $0x378] sm:$0xff]  ;;  %v710_v31 = vld [vmem:[#allocation5 + $0xb80] sm:$0xff] }
  0x8e   :  { %1869 = vmatprep.subr.bf16.mxu0 %v1868_v3  ;;  %v56_v3 = vld [vmem:[#allocation2 + $0x10] sm:$0xff]  ;;  %v196_v29 = vrot.slane %v195_v19, 4  ;;  %v143_v41 = vadd.f32 %v142_v38, %v141_v24  ;;  %v709_v53 = vld [vmem:[#allocation5 + $0xb78] sm:$0xff]  ;;  %v1636_v18 = vpack.c.bf16 %v453_v7, %v451_v6 }
  0x8f   :  { %v308_v30 = vrot.slane %v307_v20, 4  ;;  %v132_v55 = vadd.f32 %v72_v47, %v56_v3  ;;  %v255_v61 = vadd.f32 %v254_v39, %v253_v25  ;;  %v711_v25 = vld [vmem:[#allocation5 + $0xb88] sm:$0xff]  ;;  %v712_v39 = vld [vmem:[#allocation5 + $0xb90] sm:$0xff]  ;;  %v721_v5 = vld [vmem:[#allocation5 + $0xbd8] sm:$0xff] }
  0x90   :  { %1615 = vmatpush1.bf16.msra.mxu1 %v1614_v48  ;;  %v88_v48 = vld [vmem:[#allocation2 + $0x110] sm:$0xff]  ;;  %v197_v42 = vadd.f32 %v196_v29, %v195_v19  ;;  %v713_v29 = vld [vmem:[#allocation5 + $0xb98] sm:$0xff] }
  0x91   :  { %1871 = vmatpush1.bf16.msra.mxu0 %v1870_v58  ;;  %1617 = vmatprep.subr.bf16.mxu1 %v1616_v59  ;;  %v1628_v58 = vpack.c.bf16 %v2350_v10, %v2348_v9  ;;  %v1884_v59 = vpack.c.bf16 %v2354_v23, %v2352_v11  ;;  %v309_v43 = vadd.f32 %v308_v30, %v307_v20  ;;  %v256_v9 = vrot.slane %v255_v61, 1 }
  0x92   :  { %1873 = vmatprep.subr.bf16.mxu0 %v1872_v37  ;;  %v64_v37 = vld [vmem:[#allocation2 + $0x50] sm:$0xff]  ;;  %v133_v12 = vrot.slane %v132_v55, 4  ;;  %v1892_v20 = vpack.c.bf16 %v709_v53, %v707_v26  ;;  %v1894_v30 = vpack.c.bf16 %v708_v34, %v706_v33  ;;  %v1896_v38 = vpack.c.bf16 %v713_v29, %v711_v25  ;;  %v718_v26 = vld [vmem:[#allocation5 + $0xbc0] sm:$0xff]  ;;  %v727_v25 = vld [vmem:[#allocation5 + $0xc08] sm:$0xff] }
  0x93   :  { %v310_v46 = vrot.slane %v309_v43, 2  ;;  %v188_v0 = vadd.f32 %v80_v44, %v64_v37  ;;  %v257_v1 = vadd.f32 %v256_v9, %v255_v61  ;;  %v715_v44 = vld [vmem:[#allocation5 + $0xba8] sm:$0xff]  ;;  %v716_v61 = vld [vmem:[#allocation5 + $0xbb0] sm:$0xff]  ;;  %v729_v29 = vld [vmem:[#allocation5 + $0xc18] sm:$0xff] }
  0x94   :  { %1619 = vmatpush1.bf16.msra.mxu1 %v1618_v49  ;;  %v112_v49 = vld [vmem:[#allocation2 + $0x1d0] sm:$0xff] }
  0x95   :  { %1875 = vmatpush1.bf16.msra.mxu0 %v1874_v56  ;;  %1621 = vmatprep.subr.bf16.mxu1 %v1620_v57  ;;  %v244_v56 = vadd.f32 %v104_v4, %v88_v48  ;;  %v446_v57 = vld [vmem:[#allocation5 + $0x340] sm:$0xff]  ;;  %v300_v52 = vadd.f32 %v112_v49, %v96_v40  ;;  %v311_v11 = vadd.f32 %v310_v46, %v309_v43  ;;  %v189_v2 = vrot.slane %v188_v0, 4  ;;  %v461_v43 = vld [vmem:[#allocation5 + $0x3b8] sm:$0xff] }
  0x96   :  { %1877 = vmatprep.subr.bf16.mxu0 %v1876_v45  ;;  %v198_v45 = vrot.slane %v197_v42, 2  ;;  %v1634_v23 = vpack.c.bf16 %v448_v60, %v446_v57  ;;  %v134_v48 = vadd.f32 %v133_v12, %v132_v55  ;;  %v717_v40 = vld [vmem:[#allocation5 + $0xbb8] sm:$0xff]  ;;  %v460_v60 = vld [vmem:[#allocation5 + $0x3b0] sm:$0xff] }
  0x97   :  { %v245_v14 = vrot.slane %v244_v56, 4  ;;  %v312_v16 = vrot.slane %v311_v11, 1  ;;  %v301_v19 = vrot.slane %v300_v52, 4  ;;  %v190_v32 = vadd.f32 %v189_v2, %v188_v0  ;;  %v465_v0 = vld [vmem:[#allocation5 + $0x3d8] sm:$0xff] }
  0x98   :  { %1623 = vmatpush1.bf16.msra.mxu1 %v1622_v8  ;;  %v144_v8 = vrot.slane %v143_v41, 1  ;;  %v199_v10 = vadd.f32 %v198_v45, %v197_v42  ;;  %v459_v42 = vld [vmem:[#allocation5 + $0x3a8] sm:$0xff] }
  0x99   :  { %1879 = vmatpush1.bf16.msra.mxu0 %v1878_v27  ;;  %1625 = vmatprep.subr.bf16.mxu1 %v1624_v28  ;;  %v450_v27 = vld [vmem:[#allocation5 + $0x360] sm:$0xff]  ;;  %v452_v28 = vld [vmem:[#allocation5 + $0x370] sm:$0xff]  ;;  %v313_v3 = vadd.f32 %v312_v16, %v311_v11  ;;  %v246_v4 = vadd.f32 %v245_v14, %v244_v56  ;;  %v302_v37 = vadd.f32 %v301_v19, %v300_v52  ;;  %v191_v45 = vrot.slane %v190_v32, 2  ;;  %v719_v52 = vld [vmem:[#allocation5 + $0xbc8] sm:$0xff] }
  0x9a   :  { %1881 = vmatprep.subr.bf16.mxu0 %v1880_v54  ;;  %v145_v54 = vadd.f32 %v144_v8, %v143_v41  ;;  %v200_v15 = vrot.slane %v199_v10, 1  ;;  %v1638_v24 = vpack.c.bf16 %v452_v28, %v450_v27  ;;  %v1898_v56 = vpack.c.bf16 %v712_v39, %v710_v31  ;;  %v714_v41 = vld [vmem:[#allocation5 + $0xba0] sm:$0xff]  ;;  %v720_v27 = vld [vmem:[#allocation5 + $0xbd0] sm:$0xff]  ;;  %v467_v28 = vld [vmem:[#allocation5 + $0x3e8] sm:$0xff] }
  0x9b   :  { %v247_v55 = vrot.slane %v246_v4, 2  ;;  %v1644_v57 = vpack.c.bf16 %v461_v43, %v459_v42  ;;  %v303_v46 = vrot.slane %v302_v37, 2  ;;  %v1902_v7 = vpack.c.bf16 %v716_v61, %v714_v41  ;;  %v462_v11 = vld [vmem:[#allocation5 + $0x3c0] sm:$0xff]  ;;  %v468_v19 = vld [vmem:[#allocation5 + $0x3f0] sm:$0xff]  ;;  %v475_v42 = vld [vmem:[#allocation5 + $0x428] sm:$0xff] }
  0x9c   :  { %1627 = vmatpush1.bf16.msra.mxu1 %v1626_v21  ;;  %v455_v21 = vld [vmem:[#allocation5 + $0x388] sm:$0xff]  ;;  %v902_v35 = vsel %vm898_vm0, %v257_v1, %v145_v54  ;;  %v201_v36 = vadd.f32 %v200_v15, %v199_v10  ;;  %v1648_v10 = vpack.c.bf16 %v465_v0, %v463_v63  ;;  %v192_v53 = vadd.f32 %v191_v45, %v190_v32  ;;  %v469_v54 = vld [vmem:[#allocation5 + $0x3f8] sm:$0xff]  ;;  %v728_v39 = vld [vmem:[#allocation5 + $0xc10] sm:$0xff] }
  0x9d   :  { %1883 = vmatpush1.bf16.msra.mxu0 %v1882_v22  ;;  %1629 = vmatprep.subr.bf16.mxu1 %v1628_v58  ;;  %v457_v22 = vld [vmem:[#allocation5 + $0x398] sm:$0xff]  ;;  %v248_v9 = vadd.f32 %v247_v55, %v246_v4  ;;  %v304_v12 = vadd.f32 %v303_v46, %v302_v37  ;;  %v1904_v14 = vpack.c.bf16 %v721_v5, %v719_v52  ;;  %v723_v1 = vld [vmem:[#allocation5 + $0xbe8] sm:$0xff]  ;;  %v726_v37 = vld [vmem:[#allocation5 + $0xc00] sm:$0xff] }
  0x9e   :  { %1885 = vmatprep.subr.bf16.mxu0 %v1884_v59  ;;  %1066 = vmatprep.mubr.f32.mxu1 %v902_v35  ;;  %v910_v47 = vsel %vm898_vm0, %v313_v3, %v201_v36  ;;  %v1640_v58 = vpack.c.bf16 %v457_v22, %v455_v21  ;;  %v454_v59 = vld [vmem:[#allocation5 + $0x380] sm:$0xff]  ;;  %v725_v15 = vld [vmem:[#allocation5 + $0xbf8] sm:$0xff]  ;;  %v1906_v34 = vpack.c.bf16 %v720_v27, %v718_v26  ;;  %v724_v21 = vld [vmem:[#allocation5 + $0xbf0] sm:$0xff]  ;;  %v193_v22 = vrot.slane %v192_v53, 1 }
  0x9f   :  { %1350 = vmatprep.mubr.f32.mxu0 %v910_v47  ;;  %v249_v33 = vrot.slane %v248_v9, 1  ;;  %v1652_v2 = vpack.c.bf16 %v469_v54, %v467_v28  ;;  %v305_v35 = vrot.slane %v304_v12, 1  ;;  %v1908_v36 = vpack.c.bf16 %v725_v15, %v723_v1  ;;  %v471_v3 = vld [vmem:[#allocation5 + $0x408] sm:$0xff]  ;;  %v477_v43 = vld [vmem:[#allocation5 + $0x438] sm:$0xff]  ;;  %v730_v41 = vld [vmem:[#allocation5 + $0xc20] sm:$0xff] }
  0xa0   :  { %1631 = vmatpush1.bf16.msra.mxu1 %v1630_v13  ;;  %v456_v13 = vld [vmem:[#allocation5 + $0x390] sm:$0xff]  ;;  %v194_v31 = vadd.f32 %v193_v22, %v192_v53  ;;  %v1914_v55 = vpack.c.bf16 %v728_v39, %v726_v37  ;;  %v479_v46 = vld [vmem:[#allocation5 + $0x448] sm:$0xff]  ;;  %v737_v0 = vld [vmem:[#allocation5 + $0xc58] sm:$0xff] }
  0xa1   :  { %1887 = vmatpush1.bf16.msra.mxu0 %v1886_v50  ;;  %1633 = vmatprep.subr.bf16.mxu1 %v1632_v51  ;;  %v1642_v49 = vpack.c.bf16 %v456_v13, %v454_v59  ;;  %v458_v50 = vld [vmem:[#allocation5 + $0x3a0] sm:$0xff]  ;;  %v135_v51 = vrot.slane %v134_v48, 2  ;;  %v250_v4 = vadd.f32 %v249_v33, %v248_v9  ;;  %v472_v13 = vld [vmem:[#allocation5 + $0x410] sm:$0xff]  ;;  %v306_v32 = vadd.f32 %v305_v35, %v304_v12  ;;  %v735_v63 = vld [vmem:[#allocation5 + $0xc48] sm:$0xff] }
  0xa2   :  { %1889 = vmatprep.subr.bf16.mxu0 %v1888_v62  ;;  %v1900_v62 = vpack.c.bf16 %v717_v40, %v715_v44  ;;  %v1646_v6 = vpack.c.bf16 %v460_v60, %v458_v50  ;;  %v470_v59 = vld [vmem:[#allocation5 + $0x400] sm:$0xff]  ;;  %v731_v44 = vld [vmem:[#allocation5 + $0xc28] sm:$0xff]  ;;  %v733_v40 = vld [vmem:[#allocation5 + $0xc38] sm:$0xff] }
  0xa3   :  { %v136_v8 = vadd.f32 %v135_v51, %v134_v48  ;;  %v1658_v50 = vpack.c.bf16 %v472_v13, %v470_v59  ;;  %v909_v51 = vsel %vm898_vm0, %v306_v32, %v194_v31  ;;  %v476_v60 = vld [vmem:[#allocation5 + $0x430] sm:$0xff]  ;;  %v1916_v61 = vpack.c.bf16 %v733_v40, %v731_v44  ;;  %v478_v5 = vld [vmem:[#allocation5 + $0x440] sm:$0xff]  ;;  %v485_v26 = vld [vmem:[#allocation5 + $0x478] sm:$0xff] }
  0xa4   :  { %1635 = vmatpush1.bf16.msra.mxu1 %v1634_v23  ;;  %v464_v23 = vld [vmem:[#allocation5 + $0x3d0] sm:$0xff]  ;;  %v734_v9 = vld [vmem:[#allocation5 + $0xc40] sm:$0xff]  ;;  %v739_v53 = vld [vmem:[#allocation5 + $0xc68] sm:$0xff] }
  0xa5   :  { %1891 = vmatpush1.bf16.msra.mxu0 %v1890_v17  ;;  %1637 = vmatprep.subr.bf16.mxu1 %v1636_v18  ;;  %v1650_v16 = vpack.c.bf16 %v464_v23, %v462_v11  ;;  %v466_v17 = vld [vmem:[#allocation5 + $0x3e0] sm:$0xff]  ;;  %v137_v18 = vrot.slane %v136_v8, 1  ;;  %v732_v45 = vld [vmem:[#allocation5 + $0xc30] sm:$0xff]  ;;  %v1920_v11 = vpack.c.bf16 %v737_v0, %v735_v63  ;;  %v483_v23 = vld [vmem:[#allocation5 + $0x468] sm:$0xff] }
  0xa6   :  { %1893 = vmatprep.subr.bf16.mxu0 %v1892_v20  ;;  %v722_v20 = vld [vmem:[#allocation5 + $0xbe0] sm:$0xff]  ;;  %v741_v12 = vld [vmem:[#allocation5 + $0xc78] sm:$0xff]  ;;  %v484_v27 = vld [vmem:[#allocation5 + $0x470] sm:$0xff] }
  0xa7   :  { %v1910_v47 = vpack.c.bf16 %v724_v21, %v722_v20  ;;  %v138_v48 = vadd.f32 %v137_v18, %v136_v8  ;;  %v480_v8 = vld [vmem:[#allocation5 + $0x450] sm:$0xff]  ;;  %v738_v54 = vld [vmem:[#allocation5 + $0xc60] sm:$0xff]  ;;  %v487_v15 = vld [vmem:[#allocation5 + $0x488] sm:$0xff] }
  0xa8   :  { %1639 = vmatpush1.bf16.msra.mxu1 %v1638_v24  ;;  %v473_v24 = vld [vmem:[#allocation5 + $0x418] sm:$0xff]  ;;  %v1666_v28 = vpack.c.bf16 %v480_v8, %v478_v5  ;;  %v740_v1 = vld [vmem:[#allocation5 + $0xc70] sm:$0xff]  ;;  %v743_v33 = vld [vmem:[#allocation5 + $0xc88] sm:$0xff] }
  0xa9   :  { %1895 = vmatpush1.bf16.msra.mxu0 %v1894_v30  ;;  %1641 = vmatprep.subr.bf16.mxu1 %v1640_v58  ;;  %v1654_v30 = vpack.c.bf16 %v468_v19, %v466_v17  ;;  %v1656_v58 = vpack.c.bf16 %v473_v24, %v471_v3  ;;  %v1668_v17 = vpack.c.bf16 %v485_v26, %v483_v23  ;;  %v489_v18 = vld [vmem:[#allocation5 + $0x498] sm:$0xff]  ;;  %v486_v19 = vld [vmem:[#allocation5 + $0x480] sm:$0xff]  ;;  %v488_v20 = vld [vmem:[#allocation5 + $0x490] sm:$0xff] }
  0xaa   :  { %1897 = vmatprep.subr.bf16.mxu0 %v1896_v38  ;;  %v1912_v38 = vpack.c.bf16 %v729_v29, %v727_v25  ;;  %v59_v21 = vld [vmem:[#allocation2 + $0x28] sm:$0xff]  ;;  %v742_v24 = vld [vmem:[#allocation5 + $0xc80] sm:$0xff]  ;;  %v744_v25 = vld [vmem:[#allocation5 + $0xc90] sm:$0xff] }
  0xab   :  { %v75_v22 = vld [vmem:[#allocation2 + $0xa8] sm:$0xff]  ;;  %v493_v37 = vld [vmem:[#allocation5 + $0x4b8] sm:$0xff]  ;;  %v496_v23 = vld [vmem:[#allocation5 + $0x4d0] sm:$0xff] }
  0xac   :  { %1643 = vmatpush1.bf16.msra.mxu1 %v1642_v49  ;;  %v901_v49 = vsel %vm898_vm0, %v250_v4, %v138_v48  ;;  %v91_v35 = vld [vmem:[#allocation2 + $0x128] sm:$0xff]  ;;  %v1926_v4 = vpack.c.bf16 %v740_v1, %v738_v54  ;;  %v749_v39 = vld [vmem:[#allocation5 + $0xcb8] sm:$0xff]  ;;  %v750_v1 = vld [vmem:[#allocation5 + $0xcc0] sm:$0xff] }
  0xad   :  { %1899 = vmatpush1.bf16.msra.mxu0 %v1898_v56  ;;  %1645 = vmatprep.subr.bf16.mxu1 %v1644_v57  ;;  %v1660_v56 = vpack.c.bf16 %v477_v43, %v475_v42  ;;  %v474_v57 = vld [vmem:[#allocation5 + $0x420] sm:$0xff]  ;;  %v491_v29 = vld [vmem:[#allocation5 + $0x4a8] sm:$0xff]  ;;  %v497_v0 = vld [vmem:[#allocation5 + $0x4d8] sm:$0xff] }
  0xae   :  { %1901 = vmatprep.subr.bf16.mxu0 %v1900_v62  ;;  %v481_v62 = vld [vmem:[#allocation5 + $0x458] sm:$0xff]  ;;  %v1662_v52 = vpack.c.bf16 %v476_v60, %v474_v57  ;;  %v67_v48 = vld [vmem:[#allocation2 + $0x68] sm:$0xff] }
  0xaf   :  { %v83_v13 = vld [vmem:[#allocation2 + $0xe8] sm:$0xff]  ;;  %v753_v5 = vld [vmem:[#allocation5 + $0xcd8] sm:$0xff] }
  0xb0   :  { %1647 = vmatpush1.bf16.msra.mxu1 %v1646_v6  ;;  %v1918_v6 = vpack.c.bf16 %v732_v45, %v730_v41  ;;  %v99_v31 = vld [vmem:[#allocation2 + $0x168] sm:$0xff]  ;;  %v209_v44 = vadd.f32 %v83_v13, %v67_v48  ;;  %v1930_v41 = vpack.c.bf16 %v744_v25, %v742_v24 }
  0xb1   :  { %1903 = vmatpush1.bf16.msra.mxu0 %v1902_v7  ;;  %1649 = vmatprep.subr.bf16.mxu1 %v1648_v10  ;;  %v1664_v7 = vpack.c.bf16 %v481_v62, %v479_v46  ;;  %v736_v10 = vld [vmem:[#allocation5 + $0xc50] sm:$0xff]  ;;  %v115_v32 = vld [vmem:[#allocation2 + $0x1e8] sm:$0xff]  ;;  %v746_v46 = vld [vmem:[#allocation5 + $0xca0] sm:$0xff] }
  0xb2   :  { %1905 = vmatprep.subr.bf16.mxu0 %v1904_v14  ;;  %v482_v14 = vld [vmem:[#allocation5 + $0x460] sm:$0xff]  ;;  %v321_v40 = vadd.f32 %v115_v32, %v99_v31  ;;  %v210_v57 = vrot.slane %v209_v44, 4  ;;  %v748_v62 = vld [vmem:[#allocation5 + $0xcb0] sm:$0xff]  ;;  %v495_v63 = vld [vmem:[#allocation5 + $0x4c8] sm:$0xff] }
  0xb3   :  { %v1670_v3 = vpack.c.bf16 %v484_v27, %v482_v14  ;;  %v1934_v27 = vpack.c.bf16 %v748_v62, %v746_v46  ;;  %v762_v46 = vld [vmem:[#allocation5 + $0xd20] sm:$0xff]  ;;  %v764_v62 = vld [vmem:[#allocation5 + $0xd30] sm:$0xff] }
  0xb4   :  { %1651 = vmatpush1.bf16.msra.mxu1 %v1650_v16  ;;  %v1922_v16 = vpack.c.bf16 %v736_v10, %v734_v9  ;;  %v322_v60 = vrot.slane %v321_v40, 4  ;;  %v211_v8 = vadd.f32 %v210_v57, %v209_v44  ;;  %v509_v57 = vld [vmem:[#allocation5 + $0x538] sm:$0xff] }
  0xb5   :  { %1907 = vmatpush1.bf16.msra.mxu0 %v1906_v34  ;;  %1653 = vmatprep.subr.bf16.mxu1 %v1652_v2  ;;  %v745_v34 = vld [vmem:[#allocation5 + $0xc98] sm:$0xff]  ;;  %v1924_v2 = vpack.c.bf16 %v741_v12, %v739_v53 }
  0xb6   :  { %1909 = vmatprep.subr.bf16.mxu0 %v1908_v36  ;;  %v107_v36 = vld [vmem:[#allocation2 + $0x1a8] sm:$0xff]  ;;  %v1928_v59 = vpack.c.bf16 %v745_v34, %v743_v33  ;;  %v323_v9 = vadd.f32 %v322_v60, %v321_v40  ;;  %v212_v12 = vrot.slane %v211_v8, 2 }
  0xb7   :  { %v763_v60 = vld [vmem:[#allocation5 + $0xd28] sm:$0xff] }
  0xb8   :  { %1655 = vmatpush1.bf16.msra.mxu1 %v1654_v30  ;;  %v153_v30 = vadd.f32 %v75_v22, %v59_v21  ;;  %v324_v14 = vrot.slane %v323_v9, 2  ;;  %v213_v34 = vadd.f32 %v212_v12, %v211_v8  ;;  %v757_v21 = vld [vmem:[#allocation5 + $0xcf8] sm:$0xff]  ;;  %v114_v12 = vld [vmem:[#allocation2 + $0x1e0] sm:$0xff] }
  0xb9   :  { %1911 = vmatpush1.bf16.msra.mxu0 %v1910_v47  ;;  %1657 = vmatprep.subr.bf16.mxu1 %v1656_v58  ;;  %v265_v47 = vadd.f32 %v107_v36, %v91_v35  ;;  %v1672_v58 = vpack.c.bf16 %v489_v18, %v487_v15  ;;  %v752_v15 = vld [vmem:[#allocation5 + $0xcd0] sm:$0xff] }
  0xba   :  { %1913 = vmatprep.subr.bf16.mxu0 %v1912_v38  ;;  %v747_v38 = vld [vmem:[#allocation5 + $0xca8] sm:$0xff]  ;;  %v154_v42 = vrot.slane %v153_v30, 4  ;;  %v214_v36 = vrot.slane %v213_v34, 1  ;;  %v1938_v24 = vpack.c.bf16 %v752_v15, %v750_v1 }
  0xbb   :  { %1067 = vmatmul.mubr.f32.vlgmr.msra.gmra.mrb[0].mxu1 %v901_v49  ;;  %v266_v43 = vrot.slane %v265_v47, 4  ;;  %v1674_v49 = vpack.c.bf16 %v488_v20, %v486_v19  ;;  %v1932_v45 = vpack.c.bf16 %v749_v39, %v747_v38  ;;  %v755_v20 = vld [vmem:[#allocation5 + $0xce8] sm:$0xff]  ;;  %v761_v38 = vld [vmem:[#allocation5 + $0xd18] sm:$0xff] }
  0xbc   :  { %1659 = vmatpush1.bf16.msra.mxu1 %v1658_v50  ;;  %1351 = vmatmul.mubr.f32.vlgmr.msra.gmra.mrb[0].mxu0 %v909_v51  ;;  %v490_v50 = vld [vmem:[#allocation5 + $0x4a0] sm:$0xff]  ;;  %v492_v51 = vld [vmem:[#allocation5 + $0x4b0] sm:$0xff]  ;;  %v1940_v48 = vpack.c.bf16 %v757_v21, %v755_v20  ;;  %v215_v31 = vadd.f32 %v214_v36, %v213_v34  ;;  %v515_v21 = vld [vmem:[#allocation5 + $0x568] sm:$0xff] }
  0xbd   :  { %1915 = vmatpush1.bf16.msra.mxu0 %v1914_v55  ;;  %1661 = vmatprep.subr.bf16.mxu1 %v1660_v56  ;;  %v155_v55 = vadd.f32 %v154_v42, %v153_v30  ;;  %v267_v56 = vadd.f32 %v266_v43, %v265_v47  ;;  %v1678_v10 = vpack.c.bf16 %v492_v51, %v490_v50  ;;  %v500_v30 = vld [vmem:[#allocation5 + $0x4f0] sm:$0xff]  ;;  %v754_v47 = vld [vmem:[#allocation5 + $0xce0] sm:$0xff]  ;;  %v773_v36 = vld [vmem:[#allocation5 + $0xd78] sm:$0xff] }
  0xbe   :  { %1917 = vmatprep.subr.bf16.mxu0 %v1916_v61  ;;  %v1676_v61 = vpack.c.bf16 %v493_v37, %v491_v29  ;;  %v498_v29 = vld [vmem:[#allocation5 + $0x4e0] sm:$0xff]  ;;  %v759_v37 = vld [vmem:[#allocation5 + $0xd08] sm:$0xff]  ;;  %v504_v43 = vld [vmem:[#allocation5 + $0x510] sm:$0xff] }
  0xbf   :  { %v1686_v39 = vpack.c.bf16 %v500_v30, %v498_v29  ;;  %v502_v42 = vld [vmem:[#allocation5 + $0x500] sm:$0xff]  ;;  %v760_v51 = vld [vmem:[#allocation5 + $0xd10] sm:$0xff] }
  0xc0   :  { %1663 = vmatpush1.bf16.msra.mxu1 %v1662_v52  ;;  %v751_v52 = vld [vmem:[#allocation5 + $0xcc8] sm:$0xff]  ;;  %v758_v50 = vld [vmem:[#allocation5 + $0xd00] sm:$0xff]  ;;  %v768_v20 = vld [vmem:[#allocation5 + $0xd50] sm:$0xff] }
  0xc1   :  { %1919 = vmatpush1.bf16.msra.mxu0 %v1918_v6  ;;  %1665 = vmatprep.subr.bf16.mxu1 %v1664_v7  ;;  %v156_v6 = vrot.slane %v155_v55, 2  ;;  %v268_v7 = vrot.slane %v267_v56, 2  ;;  %v1936_v54 = vpack.c.bf16 %v753_v5, %v751_v52  ;;  %v513_v52 = vld [vmem:[#allocation5 + $0x558] sm:$0xff]  ;;  %v58_v5 = vld [vmem:[#allocation2 + $0x20] sm:$0xff] }
  0xc2   :  { %1921 = vmatprep.subr.bf16.mxu0 %v1920_v11  ;;  %v494_v11 = vld [vmem:[#allocation5 + $0x4c0] sm:$0xff] }
  0xc3   :  { %v157_v26 = vadd.f32 %v156_v6, %v155_v55  ;;  %v269_v53 = vadd.f32 %v268_v7, %v267_v56  ;;  %v1682_v19 = vpack.c.bf16 %v496_v23, %v494_v11  ;;  %v507_v55 = vld [vmem:[#allocation5 + $0x528] sm:$0xff]  ;;  %v1944_v56 = vpack.c.bf16 %v761_v38, %v759_v37  ;;  %v74_v6 = vld [vmem:[#allocation2 + $0xa0] sm:$0xff]  ;;  %v521_v37 = vld [vmem:[#allocation5 + $0x598] sm:$0xff] }
  0xc4   :  { %1667 = vmatpush1.bf16.msra.mxu1 %v1666_v28  ;;  %v1680_v28 = vpack.c.bf16 %v497_v0, %v495_v63  ;;  %v1690_v63 = vpack.c.bf16 %v504_v43, %v502_v42  ;;  %v511_v0 = vld [vmem:[#allocation5 + $0x548] sm:$0xff]  ;;  %v1946_v7 = vpack.c.bf16 %v760_v51, %v758_v50  ;;  %v1692_v8 = vpack.c.bf16 %v509_v57, %v507_v55  ;;  %v66_v11 = vld [vmem:[#allocation2 + $0x60] sm:$0xff]  ;;  %v520_v51 = vld [vmem:[#allocation5 + $0x590] sm:$0xff] }
  0xc5   :  { %1923 = vmatpush1.bf16.msra.mxu0 %v1922_v16  ;;  %1669 = vmatprep.subr.bf16.mxu1 %v1668_v17  ;;  %v499_v16 = vld [vmem:[#allocation5 + $0x4e8] sm:$0xff]  ;;  %v501_v17 = vld [vmem:[#allocation5 + $0x4f8] sm:$0xff]  ;;  %v158_v18 = vrot.slane %v157_v26, 1  ;;  %v270_v33 = vrot.slane %v269_v53, 1  ;;  %v146_v1 = vadd.f32 %v74_v6, %v58_v5  ;;  %v518_v50 = vld [vmem:[#allocation5 + $0x580] sm:$0xff] }
  0xc6   :  { %1925 = vmatprep.subr.bf16.mxu0 %v1924_v2  ;;  %v325_v2 = vadd.f32 %v324_v14, %v323_v9  ;;  %v1684_v25 = vpack.c.bf16 %v501_v17, %v499_v16  ;;  %v90_v9 = vld [vmem:[#allocation2 + $0x120] sm:$0xff]  ;;  %v767_v14 = vld [vmem:[#allocation5 + $0xd48] sm:$0xff]  ;;  %v1696_v16 = vpack.c.bf16 %v513_v52, %v511_v0 }
  0xc7   :  { %v159_v22 = vadd.f32 %v158_v18, %v157_v26  ;;  %v271_v35 = vadd.f32 %v270_v33, %v269_v53  ;;  %v82_v26 = vld [vmem:[#allocation2 + $0xe0] sm:$0xff]  ;;  %v512_v18 = vld [vmem:[#allocation5 + $0x550] sm:$0xff]  ;;  %v775_v38 = vld [vmem:[#allocation5 + $0xd88] sm:$0xff] }
  0xc8   :  { %1671 = vmatpush1.bf16.msra.mxu1 %v1670_v3  ;;  %v326_v3 = vrot.slane %v325_v2, 1  ;;  %v98_v53 = vld [vmem:[#allocation2 + $0x160] sm:$0xff]  ;;  %v202_v34 = vadd.f32 %v82_v26, %v66_v11 }
  0xc9   :  { %1927 = vmatpush1.bf16.msra.mxu0 %v1926_v4  ;;  %1673 = vmatprep.subr.bf16.mxu1 %v1672_v58  ;;  %v756_v4 = vld [vmem:[#allocation5 + $0xcf0] sm:$0xff]  ;;  %v503_v58 = vld [vmem:[#allocation5 + $0x508] sm:$0xff]  ;;  %v904_v13 = vsel %vm898_vm0, %v271_v35, %v159_v22  ;;  %v510_v17 = vld [vmem:[#allocation5 + $0x540] sm:$0xff] }
  0xca   :  { %1929 = vmatprep.subr.bf16.mxu0 %v1928_v59  ;;  %v505_v59 = vld [vmem:[#allocation5 + $0x518] sm:$0xff]  ;;  %v327_v32 = vadd.f32 %v326_v3, %v325_v2  ;;  %1137 = vmatprep.mubr.f32.mxu1 %v904_v13  ;;  %v1942_v40 = vpack.c.bf16 %v756_v4, %v754_v47  ;;  %v766_v33 = vld [vmem:[#allocation5 + $0xd40] sm:$0xff]  ;;  %v314_v2 = vadd.f32 %v114_v12, %v98_v53  ;;  %v771_v35 = vld [vmem:[#allocation5 + $0xd68] sm:$0xff] }
  0xcb   :  { %v517_v22 = vld [vmem:[#allocation5 + $0x578] sm:$0xff]  ;;  %v1698_v3 = vpack.c.bf16 %v512_v18, %v510_v17  ;;  %v1954_v30 = vpack.c.bf16 %v768_v20, %v766_v33  ;;  %v770_v4 = vld [vmem:[#allocation5 + $0xd60] sm:$0xff]  ;;  %v527_v53 = vld [vmem:[#allocation5 + $0x5c8] sm:$0xff] }
  0xcc   :  { %1675 = vmatpush1.bf16.msra.mxu1 %v1674_v49  ;;  %v912_v44 = vsel %vm898_vm0, %v327_v32, %v215_v31  ;;  %v1688_v49 = vpack.c.bf16 %v505_v59, %v503_v58  ;;  %v1700_v47 = vpack.c.bf16 %v517_v22, %v515_v21  ;;  %v772_v58 = vld [vmem:[#allocation5 + $0xd70] sm:$0xff]  ;;  %v203_v59 = vrot.slane %v202_v34, 4  ;;  %v519_v32 = vld [vmem:[#allocation5 + $0x588] sm:$0xff]  ;;  %v774_v55 = vld [vmem:[#allocation5 + $0xd80] sm:$0xff] }
  0xcd   :  { %1931 = vmatpush1.bf16.msra.mxu0 %v1930_v41  ;;  %1677 = vmatprep.subr.bf16.mxu1 %v1676_v61  ;;  %v765_v41 = vld [vmem:[#allocation5 + $0xd38] sm:$0xff]  ;;  %v506_v61 = vld [vmem:[#allocation5 + $0x520] sm:$0xff]  ;;  %v315_v13 = vrot.slane %v314_v2, 4  ;;  %v1956_v31 = vpack.c.bf16 %v773_v36, %v771_v35  ;;  %v1958_v43 = vpack.c.bf16 %v772_v58, %v770_v4  ;;  %v787_v35 = vld [vmem:[#allocation5 + $0xde8] sm:$0xff] }
  0xce   :  { %1933 = vmatprep.subr.bf16.mxu0 %v1932_v45  ;;  %1421 = vmatprep.mubr.f32.mxu0 %v912_v44  ;;  %v508_v45 = vld [vmem:[#allocation5 + $0x530] sm:$0xff]  ;;  %v1948_v23 = vpack.c.bf16 %v765_v41, %v763_v60  ;;  %v522_v0 = vld [vmem:[#allocation5 + $0x5a0] sm:$0xff]  ;;  %v529_v12 = vld [vmem:[#allocation5 + $0x5d8] sm:$0xff] }
  0xcf   :  { %v316_v57 = vadd.f32 %v315_v13, %v314_v2  ;;  %v776_v41 = vld [vmem:[#allocation5 + $0xd90] sm:$0xff]  ;;  %v1712_v18 = vpack.c.bf16 %v529_v12, %v527_v53  ;;  %v782_v33 = vld [vmem:[#allocation5 + $0xdc0] sm:$0xff]  ;;  %v531_v2 = vld [vmem:[#allocation5 + $0x5e8] sm:$0xff] }
  0xd0   :  { %1679 = vmatpush1.bf16.msra.mxu1 %v1678_v10  ;;  %v106_v10 = vld [vmem:[#allocation2 + $0x1a0] sm:$0xff]  ;;  %v1962_v6 = vpack.c.bf16 %v776_v41, %v774_v55  ;;  %v533_v22 = vld [vmem:[#allocation5 + $0x5f8] sm:$0xff] }
  0xd1   :  { %1935 = vmatpush1.bf16.msra.mxu0 %v1934_v27  ;;  %1681 = vmatprep.subr.bf16.mxu1 %v1680_v28  ;;  %v769_v27 = vld [vmem:[#allocation5 + $0xd58] sm:$0xff]  ;;  %v1694_v28 = vpack.c.bf16 %v508_v45, %v506_v61  ;;  %v258_v15 = vadd.f32 %v106_v10, %v90_v9  ;;  %v523_v61 = vld [vmem:[#allocation5 + $0x5a8] sm:$0xff]  ;;  %v778_v9 = vld [vmem:[#allocation5 + $0xda0] sm:$0xff]  ;;  %v1716_v13 = vpack.c.bf16 %v533_v22, %v531_v2 }
  0xd2   :  { %1937 = vmatprep.subr.bf16.mxu0 %v1936_v54  ;;  %v1950_v54 = vpack.c.bf16 %v764_v62, %v762_v46  ;;  %v525_v45 = vld [vmem:[#allocation5 + $0x5b8] sm:$0xff]  ;;  %v779_v46 = vld [vmem:[#allocation5 + $0xda8] sm:$0xff]  ;;  %v780_v10 = vld [vmem:[#allocation5 + $0xdb0] sm:$0xff] }
  0xd3   :  { %v259_v29 = vrot.slane %v258_v15, 4  ;;  %v781_v62 = vld [vmem:[#allocation5 + $0xdb8] sm:$0xff]  ;;  %v794_v2 = vld [vmem:[#allocation5 + $0xe20] sm:$0xff]  ;;  %v543_v22 = vld [vmem:[#allocation5 + $0x648] sm:$0xff] }
  0xd4   :  { %1683 = vmatpush1.bf16.msra.mxu1 %v1682_v19  ;;  %v1952_v19 = vpack.c.bf16 %v769_v27, %v767_v14  ;;  %v1964_v26 = vpack.c.bf16 %v781_v62, %v779_v46  ;;  %v783_v14 = vld [vmem:[#allocation5 + $0xdc8] sm:$0xff]  ;;  %v785_v27 = vld [vmem:[#allocation5 + $0xdd8] sm:$0xff] }
  0xd5   :  { %1939 = vmatpush1.bf16.msra.mxu0 %v1938_v24  ;;  %1685 = vmatprep.subr.bf16.mxu1 %v1684_v25  ;;  %v514_v24 = vld [vmem:[#allocation5 + $0x560] sm:$0xff]  ;;  %v147_v25 = vrot.slane %v146_v1, 4  ;;  %v1968_v21 = vpack.c.bf16 %v785_v27, %v783_v14  ;;  %v789_v36 = vld [vmem:[#allocation5 + $0xdf8] sm:$0xff]  ;;  %v795_v14 = vld [vmem:[#allocation5 + $0xe28] sm:$0xff] }
  0xd6   :  { %1941 = vmatprep.subr.bf16.mxu0 %v1940_v48  ;;  %v516_v48 = vld [vmem:[#allocation5 + $0x570] sm:$0xff]  ;;  %v69_v62 = vld [vmem:[#allocation2 + $0x78] sm:$0xff] }
  0xd7   :  { %v1702_v42 = vpack.c.bf16 %v516_v48, %v514_v24  ;;  %v148_v44 = vadd.f32 %v147_v25, %v146_v1  ;;  %v526_v1 = vld [vmem:[#allocation5 + $0x5c0] sm:$0xff]  ;;  %v532_v24 = vld [vmem:[#allocation5 + $0x5f0] sm:$0xff]  ;;  %v537_v48 = vld [vmem:[#allocation5 + $0x618] sm:$0xff] }
  0xd8   :  { %1687 = vmatpush1.bf16.msra.mxu1 %v1686_v39  ;;  %v777_v39 = vld [vmem:[#allocation5 + $0xd98] sm:$0xff]  ;;  %v786_v25 = vld [vmem:[#allocation5 + $0xde0] sm:$0xff] }
  0xd9   :  { %1943 = vmatpush1.bf16.msra.mxu0 %v1942_v40  ;;  %1689 = vmatprep.subr.bf16.mxu1 %v1688_v49  ;;  %v260_v40 = vadd.f32 %v259_v29, %v258_v15  ;;  %v1704_v49 = vpack.c.bf16 %v521_v37, %v519_v32  ;;  %v1960_v60 = vpack.c.bf16 %v777_v39, %v775_v38  ;;  %v149_v52 = vrot.slane %v148_v44, 2  ;;  %v528_v15 = vld [vmem:[#allocation5 + $0x5d0] sm:$0xff]  ;;  %v793_v32 = vld [vmem:[#allocation5 + $0xe18] sm:$0xff] }
  0xda   :  { %1945 = vmatprep.subr.bf16.mxu0 %v1944_v56  ;;  %v204_v56 = vadd.f32 %v203_v59, %v202_v34  ;;  %v784_v34 = vld [vmem:[#allocation5 + $0xdd0] sm:$0xff]  ;;  %v1714_v29 = vpack.c.bf16 %v528_v15, %v526_v1  ;;  %v1972_v39 = vpack.c.bf16 %v789_v36, %v787_v35  ;;  %v797_v27 = vld [vmem:[#allocation5 + $0xe38] sm:$0xff] }
  0xdb   :  { %v261_v5 = vrot.slane %v260_v40, 2  ;;  %v1970_v59 = vpack.c.bf16 %v784_v34, %v782_v33  ;;  %v538_v33 = vld [vmem:[#allocation5 + $0x620] sm:$0xff]  ;;  %v540_v34 = vld [vmem:[#allocation5 + $0x630] sm:$0xff]  ;;  %v545_v35 = vld [vmem:[#allocation5 + $0x658] sm:$0xff] }
  0xdc   :  { %1691 = vmatpush1.bf16.msra.mxu1 %v1690_v63  ;;  %v1706_v63 = vpack.c.bf16 %v520_v51, %v518_v50  ;;  %v205_v11 = vrot.slane %v204_v56, 2 }
  0xdd   :  { %1947 = vmatpush1.bf16.msra.mxu0 %v1946_v7  ;;  %1693 = vmatprep.subr.bf16.mxu1 %v1692_v8  ;;  %v1708_v7 = vpack.c.bf16 %v525_v45, %v523_v61  ;;  %v524_v8 = vld [vmem:[#allocation5 + $0x5b0] sm:$0xff]  ;;  %v262_v17 = vadd.f32 %v261_v5, %v260_v40 }
  0xde   :  { %1949 = vmatprep.subr.bf16.mxu0 %v1948_v23  ;;  %v317_v23 = vrot.slane %v316_v57, 2  ;;  %v2390_v40 = vld [vmem:[#allocation5 + $0xe10] sm:$0xff] }
  0xdf   :  { %v263_v58 = vrot.slane %v262_v17, 1 }
  0xe0   :  { %1695 = vmatpush1.bf16.msra.mxu1 %v1694_v28  ;;  %v1710_v28 = vpack.c.bf16 %v524_v8, %v522_v0  ;;  %v318_v20 = vadd.f32 %v317_v23, %v316_v57  ;;  %v93_v57 = vld [vmem:[#allocation2 + $0x138] sm:$0xff] }
  0xe1   :  { %1951 = vmatpush1.bf16.msra.mxu0 %v1950_v54  ;;  %1697 = vmatprep.subr.bf16.mxu1 %v1696_v16  ;;  %v1966_v54 = vpack.c.bf16 %v780_v10, %v778_v9  ;;  %v150_v16 = vadd.f32 %v149_v52, %v148_v44  ;;  %v2388_v44 = vld [vmem:[#allocation5 + $0xe00] sm:$0xff]  ;;  %v264_v61 = vadd.f32 %v263_v58, %v262_v17  ;;  %v101_v0 = vld [vmem:[#allocation2 + $0x178] sm:$0xff]  ;;  %v539_v9 = vld [vmem:[#allocation5 + $0x628] sm:$0xff] }
  0xe2   :  { %1953 = vmatprep.subr.bf16.mxu0 %v1952_v19  ;;  %v206_v19 = vadd.f32 %v205_v11, %v204_v56  ;;  %v319_v38 = vrot.slane %v318_v20, 1  ;;  %v77_v56 = vld [vmem:[#allocation2 + $0xb8] sm:$0xff]  ;;  %v1978_v12 = vpack.c.bf16 %v2390_v40, %v2388_v44 }
  0xe3   :  { %v151_v4 = vrot.slane %v150_v16, 1  ;;  %v541_v10 = vld [vmem:[#allocation5 + $0x638] sm:$0xff] }
  0xe4   :  { %1699 = vmatpush1.bf16.msra.mxu1 %v1698_v3  ;;  %v530_v3 = vld [vmem:[#allocation5 + $0x5e0] sm:$0xff]  ;;  %v207_v37 = vrot.slane %v206_v19, 1  ;;  %v320_v5 = vadd.f32 %v319_v38, %v318_v20  ;;  %v1980_v20 = vpack.c.bf16 %v797_v27, %v795_v14  ;;  %v549_v44 = vld [vmem:[#allocation5 + $0x678] sm:$0xff] }
  0xe5   :  { %1955 = vmatpush1.bf16.msra.mxu0 %v1954_v30  ;;  %1701 = vmatprep.subr.bf16.mxu1 %v1700_v47  ;;  %v788_v30 = vld [vmem:[#allocation5 + $0xdf0] sm:$0xff]  ;;  %v535_v47 = vld [vmem:[#allocation5 + $0x608] sm:$0xff]  ;;  %v1718_v50 = vpack.c.bf16 %v532_v24, %v530_v3  ;;  %v152_v41 = vadd.f32 %v151_v4, %v150_v16  ;;  %v550_v27 = vld [vmem:[#allocation5 + $0x680] sm:$0xff] }
  0xe6   :  { %1957 = vmatprep.subr.bf16.mxu0 %v1956_v31  ;;  %v791_v31 = vld [vmem:[#allocation5 + $0xe08] sm:$0xff]  ;;  %v1974_v51 = vpack.c.bf16 %v788_v30, %v786_v25  ;;  %v1720_v55 = vpack.c.bf16 %v537_v48, %v535_v47  ;;  %v208_v52 = vadd.f32 %v207_v37, %v206_v19  ;;  %v1726_v47 = vpack.c.bf16 %v540_v34, %v538_v33  ;;  %v798_v37 = vld [vmem:[#allocation5 + $0xe40] sm:$0xff]  ;;  %v813_v33 = vld [vmem:[#allocation5 + $0xeb8] sm:$0xff] }
  0xe7   :  { %v1976_v8 = vpack.c.bf16 %v793_v32, %v791_v31  ;;  %v799_v25 = vld [vmem:[#allocation5 + $0xe48] sm:$0xff]  ;;  %v542_v31 = vld [vmem:[#allocation5 + $0x640] sm:$0xff]  ;;  %v544_v32 = vld [vmem:[#allocation5 + $0x650] sm:$0xff] }
  0xe8   :  { %1703 = vmatpush1.bf16.msra.mxu1 %v1702_v42  ;;  %v534_v42 = vld [vmem:[#allocation5 + $0x600] sm:$0xff]  ;;  %v911_v17 = vsel %vm898_vm0, %v320_v5, %v208_v52 }
  0xe9   :  { %1959 = vmatpush1.bf16.msra.mxu0 %v1958_v43  ;;  %1705 = vmatprep.subr.bf16.mxu1 %v1704_v49  ;;  %v536_v43 = vld [vmem:[#allocation5 + $0x610] sm:$0xff]  ;;  %v61_v49 = vld [vmem:[#allocation2 + $0x38] sm:$0xff] }
  0xea   :  { %1961 = vmatprep.subr.bf16.mxu0 %v1960_v60  ;;  %v109_v60 = vld [vmem:[#allocation2 + $0x1b8] sm:$0xff]  ;;  %v167_v45 = vadd.f32 %v77_v56, %v61_v49  ;;  %v1722_v53 = vpack.c.bf16 %v536_v43, %v534_v42  ;;  %v800_v42 = vld [vmem:[#allocation5 + $0xe50] sm:$0xff]  ;;  %v547_v43 = vld [vmem:[#allocation5 + $0x668] sm:$0xff] }
  0xeb   :  { %v279_v46 = vadd.f32 %v109_v60, %v93_v57  ;;  %v1730_v57 = vpack.c.bf16 %v544_v32, %v542_v31  ;;  %v816_v31 = vld [vmem:[#allocation5 + $0xed0] sm:$0xff]  ;;  %v563_v32 = vld [vmem:[#allocation5 + $0x6e8] sm:$0xff] }
  0xec   :  { %1707 = vmatpush1.bf16.msra.mxu1 %v1706_v63  ;;  %v85_v63 = vld [vmem:[#allocation2 + $0xf8] sm:$0xff]  ;;  %v168_v11 = vrot.slane %v167_v45, 4 }
  0xed   :  { %1963 = vmatpush1.bf16.msra.mxu0 %v1962_v6  ;;  %1709 = vmatprep.subr.bf16.mxu1 %v1708_v7  ;;  %v117_v6 = vld [vmem:[#allocation2 + $0x1f8] sm:$0xff]  ;;  %v223_v7 = vadd.f32 %v85_v63, %v69_v62  ;;  %v280_v23 = vrot.slane %v279_v46, 4  ;;  %v546_v62 = vld [vmem:[#allocation5 + $0x660] sm:$0xff]  ;;  %v548_v63 = vld [vmem:[#allocation5 + $0x670] sm:$0xff] }
  0xee   :  { %1965 = vmatprep.subr.bf16.mxu0 %v1964_v26  ;;  %v335_v26 = vadd.f32 %v117_v6, %v101_v0  ;;  %v169_v1 = vadd.f32 %v168_v11, %v167_v45  ;;  %v1986_v45 = vpack.c.bf16 %v800_v42, %v798_v37  ;;  %v802_v0 = vld [vmem:[#allocation5 + $0xe60] sm:$0xff]  ;;  %v804_v6 = vld [vmem:[#allocation5 + $0xe70] sm:$0xff]  ;;  %v807_v11 = vld [vmem:[#allocation5 + $0xe88] sm:$0xff] }
  0xef   :  { %v281_v15 = vadd.f32 %v280_v23, %v279_v46  ;;  %v1732_v46 = vpack.c.bf16 %v549_v44, %v547_v43  ;;  %v809_v23 = vld [vmem:[#allocation5 + $0xe98] sm:$0xff] }
  0xf0   :  { %1711 = vmatpush1.bf16.msra.mxu1 %v1710_v28  ;;  %v224_v28 = vrot.slane %v223_v7, 4  ;;  %v336_v16 = vrot.slane %v335_v26, 4  ;;  %v170_v36 = vrot.slane %v169_v1, 2  ;;  %v565_v37 = vld [vmem:[#allocation5 + $0x6f8] sm:$0xff] }
  0xf1   :  { %1967 = vmatpush1.bf16.msra.mxu0 %v1966_v54  ;;  %1713 = vmatprep.subr.bf16.mxu1 %v1712_v18  ;;  %v903_v54 = vsel %vm898_vm0, %v264_v61, %v152_v41  ;;  %v1724_v18 = vpack.c.bf16 %v541_v10, %v539_v9  ;;  %v282_v3 = vrot.slane %v281_v15, 2  ;;  %v1748_v44 = vpack.c.bf16 %v565_v37, %v563_v32  ;;  %v578_v37 = vld [vmem:[#allocation5 + $0x760] sm:$0xff] }
  0xf2   :  { %1969 = vmatprep.subr.bf16.mxu0 %v1968_v21  ;;  %v225_v19 = vadd.f32 %v224_v28, %v223_v7  ;;  %v796_v21 = vld [vmem:[#allocation5 + $0xe30] sm:$0xff]  ;;  %v337_v24 = vadd.f32 %v336_v16, %v335_v26  ;;  %v171_v48 = vadd.f32 %v170_v36, %v169_v1  ;;  %v551_v7 = vld [vmem:[#allocation5 + $0x688] sm:$0xff]  ;;  %v1734_v26 = vpack.c.bf16 %v548_v63, %v546_v62 }
  0xf3   :  { %v283_v4 = vadd.f32 %v282_v3, %v281_v15  ;;  %v552_v28 = vld [vmem:[#allocation5 + $0x690] sm:$0xff]  ;;  %v1992_v1 = vpack.c.bf16 %v809_v23, %v807_v11  ;;  %v555_v16 = vld [vmem:[#allocation5 + $0x6a8] sm:$0xff]  ;;  %v826_v23 = vld [vmem:[#allocation5 + $0xf20] sm:$0xff] }
  0xf4   :  { %1715 = vmatpush1.bf16.msra.mxu1 %v1714_v29  ;;  %v801_v29 = vld [vmem:[#allocation5 + $0xe58] sm:$0xff]  ;;  %v226_v30 = vrot.slane %v225_v19, 2  ;;  %v338_v58 = vrot.slane %v337_v24, 2  ;;  %v172_v40 = vrot.slane %v171_v48, 1  ;;  %v808_v15 = vld [vmem:[#allocation5 + $0xe90] sm:$0xff]  ;;  %v1738_v34 = vpack.c.bf16 %v552_v28, %v550_v27  ;;  %v559_v3 = vld [vmem:[#allocation5 + $0x6c8] sm:$0xff] }
  0xf5   :  { %1971 = vmatpush1.bf16.msra.mxu0 %v1970_v59  ;;  %1717 = vmatprep.subr.bf16.mxu1 %v1716_v13  ;;  %v1982_v59 = vpack.c.bf16 %v796_v21, %v794_v2  ;;  %v1728_v13 = vpack.c.bf16 %v545_v35, %v543_v22  ;;  %v284_v49 = vrot.slane %v283_v4, 1  ;;  %v556_v21 = vld [vmem:[#allocation5 + $0x6b0] sm:$0xff]  ;;  %v810_v22 = vld [vmem:[#allocation5 + $0xea0] sm:$0xff] }
  0xf6   :  { %1973 = vmatprep.subr.bf16.mxu0 %v1972_v39  ;;  %v227_v38 = vadd.f32 %v226_v30, %v225_v19  ;;  %v1984_v39 = vpack.c.bf16 %v801_v29, %v799_v25  ;;  %v173_v60 = vadd.f32 %v172_v40, %v171_v48  ;;  %v812_v36 = vld [vmem:[#allocation5 + $0xeb0] sm:$0xff]  ;;  %v815_v25 = vld [vmem:[#allocation5 + $0xec8] sm:$0xff]  ;;  %v817_v29 = vld [vmem:[#allocation5 + $0xed8] sm:$0xff] }
  0xf7   :  { %v285_v41 = vadd.f32 %v284_v49, %v283_v4  ;;  %v558_v4 = vld [vmem:[#allocation5 + $0x6c0] sm:$0xff]  ;;  %v564_v49 = vld [vmem:[#allocation5 + $0x6f0] sm:$0xff] }
  0xf8   :  { %1719 = vmatpush1.bf16.msra.mxu1 %v1718_v50  ;;  %v339_v50 = vadd.f32 %v338_v58, %v337_v24  ;;  %v228_v56 = vrot.slane %v227_v38, 1  ;;  %v561_v24 = vld [vmem:[#allocation5 + $0x6d8] sm:$0xff]  ;;  %v560_v58 = vld [vmem:[#allocation5 + $0x6d0] sm:$0xff]  ;;  %v562_v40 = vld [vmem:[#allocation5 + $0x6e0] sm:$0xff] }
  0xf9   :  { %1975 = vmatpush1.bf16.msra.mxu0 %v1974_v51  ;;  %1721 = vmatprep.subr.bf16.mxu1 %v1720_v55  ;;  %v803_v51 = vld [vmem:[#allocation5 + $0xe68] sm:$0xff]  ;;  %v805_v55 = vld [vmem:[#allocation5 + $0xe78] sm:$0xff]  ;;  %v906_v9 = vsel %vm898_vm0, %v285_v41, %v173_v60  ;;  %v1744_v48 = vpack.c.bf16 %v561_v24, %v559_v3  ;;  %v1746_v42 = vpack.c.bf16 %v560_v58, %v558_v4  ;;  %v572_v11 = vld [vmem:[#allocation5 + $0x730] sm:$0xff] }
  0xfa   :  { %1977 = vmatprep.subr.bf16.mxu0 %v1976_v8  ;;  %v340_v61 = vrot.slane %v339_v50, 1  ;;  %v229_v52 = vadd.f32 %v228_v56, %v227_v38  ;;  %v1988_v5 = vpack.c.bf16 %v805_v55, %v803_v51  ;;  %v553_v8 = vld [vmem:[#allocation5 + $0x698] sm:$0xff]  ;;  %v819_v38 = vld [vmem:[#allocation5 + $0xee8] sm:$0xff]  ;;  %v820_v55 = vld [vmem:[#allocation5 + $0xef0] sm:$0xff] }
  0xfb   :  { %1138 = vmatmul.mubr.f32.vlgmr.msra.gmra.mrb[0].mxu1 %v903_v54  ;;  %v1736_v14 = vpack.c.bf16 %v553_v8, %v551_v7  ;;  %v806_v54 = vld [vmem:[#allocation5 + $0xe80] sm:$0xff]  ;;  %v567_v56 = vld [vmem:[#allocation5 + $0x708] sm:$0xff]  ;;  %v825_v41 = vld [vmem:[#allocation5 + $0xf18] sm:$0xff] }
  0xfc   :  { %1723 = vmatpush1.bf16.msra.mxu1 %v1722_v53  ;;  %1422 = vmatmul.mubr.f32.vlgmr.msra.gmra.mrb[0].mxu0 %v911_v17  ;;  %v341_v10 = vadd.f32 %v340_v61, %v339_v50  ;;  %v557_v17 = vld [vmem:[#allocation5 + $0x6b8] sm:$0xff]  ;;  %v1994_v2 = vpack.c.bf16 %v808_v15, %v806_v54  ;;  %v818_v50 = vld [vmem:[#allocation5 + $0xee0] sm:$0xff]  ;;  %v823_v60 = vld [vmem:[#allocation5 + $0xf08] sm:$0xff]  ;;  %v1750_v61 = vpack.c.bf16 %v564_v49, %v562_v40 }
  0xfd   :  { %1979 = vmatpush1.bf16.msra.mxu0 %v1978_v12  ;;  %1725 = vmatprep.subr.bf16.mxu1 %v1724_v18  ;;  %v1990_v12 = vpack.c.bf16 %v804_v6, %v802_v0  ;;  %v811_v18 = vld [vmem:[#allocation5 + $0xea8] sm:$0xff]  ;;  %v1740_v19 = vpack.c.bf16 %v557_v17, %v555_v16  ;;  %v2006_v62 = vpack.c.bf16 %v820_v55, %v818_v50  ;;  %v822_v0 = vld [vmem:[#allocation5 + $0xf00] sm:$0xff]  ;;  %v573_v7 = vld [vmem:[#allocation5 + $0x738] sm:$0xff] }
  0xfe   :  { %1981 = vmatprep.subr.bf16.mxu0 %v1980_v20  ;;  %1208 = vmatprep.mubr.f32.mxu1 %v906_v9  ;;  %v914_v53 = vsel %vm898_vm0, %v341_v10, %v229_v52  ;;  %v554_v20 = vld [vmem:[#allocation5 + $0x6a0] sm:$0xff]  ;;  %v1996_v35 = vpack.c.bf16 %v813_v33, %v811_v18  ;;  %v824_v52 = vld [vmem:[#allocation5 + $0xf10] sm:$0xff]  ;;  %v2008_v6 = vpack.c.bf16 %v825_v41, %v823_v60  ;;  %v827_v8 = vld [vmem:[#allocation5 + $0xf28] sm:$0xff] }
  0xff   :  { %1492 = vmatprep.mubr.f32.mxu0 %v914_v53  ;;  %v1742_v30 = vpack.c.bf16 %v556_v21, %v554_v20  ;;  %v829_v9 = vld [vmem:[#allocation5 + $0xf38] sm:$0xff]  ;;  %v570_v10 = vld [vmem:[#allocation5 + $0x720] sm:$0xff]  ;;  %v60_v27 = vld [vmem:[#allocation2 + $0x30] sm:$0xff]  ;;  %v2010_v54 = vpack.c.bf16 %v824_v52, %v822_v0 }
 0x100   :  { %1727 = vmatpush1.bf16.msra.mxu1 %v1726_v47  ;;  %v1998_v47 = vpack.c.bf16 %v812_v36, %v810_v22  ;;  %v76_v28 = vld [vmem:[#allocation2 + $0xb0] sm:$0xff]  ;;  %v2012_v18 = vpack.c.bf16 %v829_v9, %v827_v8  ;;  %v833_v20 = vld [vmem:[#allocation5 + $0xf58] sm:$0xff]  ;;  %v1758_v21 = vpack.c.bf16 %v572_v11, %v570_v10  ;;  %v574_v24 = vld [vmem:[#allocation5 + $0x740] sm:$0xff] }
 0x101   :  { %1983 = vmatpush1.bf16.msra.mxu0 %v1982_v59  ;;  %1729 = vmatprep.subr.bf16.mxu1 %v1728_v13  ;;  %v814_v59 = vld [vmem:[#allocation5 + $0xec0] sm:$0xff]  ;;  %v2000_v13 = vpack.c.bf16 %v817_v29, %v815_v25  ;;  %v92_v15 = vld [vmem:[#allocation2 + $0x130] sm:$0xff]  ;;  %v579_v58 = vld [vmem:[#allocation5 + $0x768] sm:$0xff] }
 0x102   :  { %1985 = vmatprep.subr.bf16.mxu0 %v1984_v39  ;;  %v821_v39 = vld [vmem:[#allocation5 + $0xef8] sm:$0xff]  ;;  %v2002_v43 = vpack.c.bf16 %v816_v31, %v814_v59  ;;  %v108_v16 = vld [vmem:[#allocation2 + $0x1b0] sm:$0xff]  ;;  %v830_v29 = vld [vmem:[#allocation5 + $0xf40] sm:$0xff] }
 0x103   :  { %v2004_v51 = vpack.c.bf16 %v821_v39, %v819_v38  ;;  %v68_v17 = vld [vmem:[#allocation2 + $0x70] sm:$0xff]  ;;  %v272_v36 = vadd.f32 %v108_v16, %v92_v15  ;;  %v581_v59 = vld [vmem:[#allocation5 + $0x778] sm:$0xff]  ;;  %v834_v40 = vld [vmem:[#allocation5 + $0xf60] sm:$0xff] }
 0x104   :  { %1731 = vmatpush1.bf16.msra.mxu1 %v1730_v57  ;;  %v569_v57 = vld [vmem:[#allocation5 + $0x718] sm:$0xff]  ;;  %v84_v33 = vld [vmem:[#allocation2 + $0xf0] sm:$0xff]  ;;  %v839_v60 = vld [vmem:[#allocation5 + $0xf88] sm:$0xff] }
 0x105   :  { %1987 = vmatpush1.bf16.msra.mxu0 %v1986_v45  ;;  %1733 = vmatprep.subr.bf16.mxu1 %v1732_v46  ;;  %v566_v45 = vld [vmem:[#allocation5 + $0x700] sm:$0xff]  ;;  %v568_v46 = vld [vmem:[#allocation5 + $0x710] sm:$0xff]  ;;  %v1752_v63 = vpack.c.bf16 %v569_v57, %v567_v56  ;;  %v837_v31 = vld [vmem:[#allocation5 + $0xf78] sm:$0xff]  ;;  %v273_v39 = vrot.slane %v272_v36, 4 }
 0x106   :  { %1989 = vmatprep.subr.bf16.mxu0 %v1988_v5  ;;  %v571_v5 = vld [vmem:[#allocation5 + $0x728] sm:$0xff]  ;;  %v1754_v53 = vpack.c.bf16 %v568_v46, %v566_v45  ;;  %v576_v25 = vld [vmem:[#allocation5 + $0x750] sm:$0xff]  ;;  %v585_v57 = vld [vmem:[#allocation5 + $0x798] sm:$0xff] }
 0x107   :  { %v832_v4 = vld [vmem:[#allocation5 + $0xf50] sm:$0xff]  ;;  %v1762_v32 = vpack.c.bf16 %v576_v25, %v574_v24  ;;  %v583_v56 = vld [vmem:[#allocation5 + $0x788] sm:$0xff]  ;;  %v841_v41 = vld [vmem:[#allocation5 + $0xf98] sm:$0xff] }
 0x108   :  { %1735 = vmatpush1.bf16.msra.mxu1 %v1734_v26  ;;  %v828_v26 = vld [vmem:[#allocation5 + $0xf30] sm:$0xff]  ;;  %v582_v0 = vld [vmem:[#allocation5 + $0x780] sm:$0xff]  ;;  %v2024_v8 = vpack.c.bf16 %v841_v41, %v839_v60  ;;  %v587_v10 = vld [vmem:[#allocation5 + $0x7a8] sm:$0xff] }
 0x109   :  { %1991 = vmatpush1.bf16.msra.mxu0 %v1990_v12  ;;  %1737 = vmatprep.subr.bf16.mxu1 %v1736_v14  ;;  %v575_v12 = vld [vmem:[#allocation5 + $0x748] sm:$0xff]  ;;  %v577_v14 = vld [vmem:[#allocation5 + $0x758] sm:$0xff]  ;;  %v2014_v22 = vpack.c.bf16 %v828_v26, %v826_v23  ;;  %v836_v49 = vld [vmem:[#allocation5 + $0xf70] sm:$0xff] }
 0x10a   :  { %1993 = vmatprep.subr.bf16.mxu0 %v1992_v1  ;;  %v1756_v1 = vpack.c.bf16 %v573_v7, %v571_v5  ;;  %v1760_v3 = vpack.c.bf16 %v577_v14, %v575_v12  ;;  %v2022_v45 = vpack.c.bf16 %v836_v49, %v834_v40  ;;  %v584_v52 = vld [vmem:[#allocation5 + $0x790] sm:$0xff]  ;;  %v838_v5 = vld [vmem:[#allocation5 + $0xf80] sm:$0xff]  ;;  %v589_v11 = vld [vmem:[#allocation5 + $0x7b8] sm:$0xff] }
 0x10b   :  { %v840_v9 = vld [vmem:[#allocation5 + $0xf90] sm:$0xff]  ;;  %v843_v23 = vld [vmem:[#allocation5 + $0xfa8] sm:$0xff]  ;;  %v845_v26 = vld [vmem:[#allocation5 + $0xfb8] sm:$0xff] }
 0x10c   :  { %1739 = vmatpush1.bf16.msra.mxu1 %v1738_v34  ;;  %v100_v34 = vld [vmem:[#allocation2 + $0x170] sm:$0xff]  ;;  %v586_v12 = vld [vmem:[#allocation5 + $0x7a0] sm:$0xff] }
 0x10d   :  { %1995 = vmatpush1.bf16.msra.mxu0 %v1994_v2  ;;  %1741 = vmatprep.subr.bf16.mxu1 %v1740_v19  ;;  %v116_v2 = vld [vmem:[#allocation2 + $0x1f0] sm:$0xff]  ;;  %v831_v19 = vld [vmem:[#allocation5 + $0xf48] sm:$0xff]  ;;  %v842_v15 = vld [vmem:[#allocation5 + $0xfa0] sm:$0xff] }
 0x10e   :  { %1997 = vmatprep.subr.bf16.mxu0 %v1996_v35  ;;  %v160_v35 = vadd.f32 %v76_v28, %v60_v27  ;;  %v2026_v28 = vpack.c.bf16 %v840_v9, %v838_v5  ;;  %v844_v16 = vld [vmem:[#allocation5 + $0xfb0] sm:$0xff]  ;;  %v590_v24 = vld [vmem:[#allocation5 + $0x7c0] sm:$0xff] }
 0x10f   :  { %v592_v25 = vld [vmem:[#allocation5 + $0x7d0] sm:$0xff]  ;;  %v854_v5 = vld [vmem:[#allocation7] sm:$0x3] }
 0x110   :  { %1743 = vmatpush1.bf16.msra.mxu1 %v1742_v30  ;;  %v216_v30 = vadd.f32 %v84_v33, %v68_v17  ;;  %v161_v38 = vrot.slane %v160_v35, 4  ;;  %v2028_v33 = vpack.c.bf16 %v845_v26, %v843_v23 }
 0x111   :  { %1999 = vmatpush1.bf16.msra.mxu0 %v1998_v47  ;;  %1745 = vmatprep.subr.bf16.mxu1 %v1744_v48  ;;  %v328_v47 = vadd.f32 %v116_v2, %v100_v34  ;;  %v2016_v48 = vpack.c.bf16 %v833_v20, %v831_v19  ;;  %v591_v34 = vld [vmem:[#allocation5 + $0x7c8] sm:$0xff]  ;;  %v593_v2 = vld [vmem:[#allocation5 + $0x7d8] sm:$0xff] }
 0x112   :  { %2001 = vmatprep.subr.bf16.mxu0 %v2000_v13  ;;  %v835_v13 = vld [vmem:[#allocation5 + $0xf68] sm:$0xff]  ;;  %v217_v50 = vrot.slane %v216_v30, 4  ;;  %v162_v46 = vadd.f32 %v161_v38, %v160_v35  ;;  %v849_v20 = vld [vmem:[#allocation5 + $0xfd8] sm:$0xff] }
 0x113   :  { %v2020_v55 = vpack.c.bf16 %v837_v31, %v835_v13  ;;  %v847_v19 = vld [vmem:[#allocation5 + $0xfc8] sm:$0xff]  ;;  %v853_v31 = vld [vmem:[#allocation5 + $0xff8] sm:$0xff] }
 0x114   :  { %1747 = vmatpush1.bf16.msra.mxu1 %v1746_v42  ;;  %v2018_v42 = vpack.c.bf16 %v832_v4, %v830_v29  ;;  %v163_v14 = vrot.slane %v162_v46, 2  ;;  %v846_v29 = vld [vmem:[#allocation5 + $0xfc0] sm:$0xff]  ;;  %v848_v4 = vld [vmem:[#allocation5 + $0xfd0] sm:$0xff]  ;;  %v851_v13 = vld [vmem:[#allocation5 + $0xfe8] sm:$0xff] }
 0x115   :  { %2003 = vmatpush1.bf16.msra.mxu0 %v2002_v43  ;;  %1749 = vmatprep.subr.bf16.mxu1 %v1748_v44  ;;  %v1764_v43 = vpack.c.bf16 %v581_v59, %v579_v58  ;;  %v580_v44 = vld [vmem:[#allocation5 + $0x770] sm:$0xff]  ;;  %v595_v58 = vld [vmem:[#allocation5 + $0x7e8] sm:$0xff]  ;;  %v597_v59 = vld [vmem:[#allocation5 + $0x7f8] sm:$0xff] }
 0x116   :  { %2005 = vmatprep.subr.bf16.mxu0 %v2004_v51  ;;  %v329_v51 = vrot.slane %v328_v47, 4  ;;  %v164_v35 = vadd.f32 %v163_v14, %v162_v46 }
 0x118   :  { %1751 = vmatpush1.bf16.msra.mxu1 %v1750_v61  ;;  %v1766_v61 = vpack.c.bf16 %v580_v44, %v578_v37  ;;  %v330_v7 = vadd.f32 %v329_v51, %v328_v47  ;;  %v165_v37 = vrot.slane %v164_v35, 1  ;;  %v596_v44 = vld [vmem:[#allocation5 + $0x7f0] sm:$0xff]  ;;  %v850_v51 = vld [vmem:[#allocation5 + $0xfe0] sm:$0xff] }
 0x119   :  { %2007 = vmatpush1.bf16.msra.mxu0 %v2006_v62  ;;  %1753 = vmatprep.subr.bf16.mxu1 %v1752_v63  ;;  %v274_v62 = vadd.f32 %v273_v39, %v272_v36  ;;  %v1768_v63 = vpack.c.bf16 %v585_v57, %v583_v56  ;;  %v2034_v39 = vpack.c.bf16 %v848_v4, %v846_v29 }
 0x11a   :  { %2009 = vmatprep.subr.bf16.mxu0 %v2008_v6  ;;  %v218_v6 = vadd.f32 %v217_v50, %v216_v30  ;;  %v2036_v50 = vpack.c.bf16 %v853_v31, %v851_v13  ;;  %v166_v57 = vadd.f32 %v165_v37, %v164_v35 }
 0x11b   :  { %v275_v27 = vrot.slane %v274_v62, 2 }
 0x11c   :  { %1755 = vmatpush1.bf16.msra.mxu1 %v1754_v53  ;;  %v1770_v53 = vpack.c.bf16 %v584_v52, %v582_v0  ;;  %v219_v17 = vrot.slane %v218_v6, 2 }
 0x11d   :  { %2011 = vmatpush1.bf16.msra.mxu0 %v2010_v54  ;;  %1757 = vmatprep.subr.bf16.mxu1 %v1756_v1  ;;  %v1772_v54 = vpack.c.bf16 %v589_v11, %v587_v10  ;;  %v588_v1 = vld [vmem:[#allocation5 + $0x7b0] sm:$0xff]  ;;  %v276_v36 = vadd.f32 %v275_v27, %v274_v62 }
 0x11e   :  { %2013 = vmatprep.subr.bf16.mxu0 %v2012_v18  ;;  %v331_v18 = vrot.slane %v330_v7, 2  ;;  %v220_v30 = vadd.f32 %v219_v17, %v218_v6 }
 0x11f   :  { %v277_v38 = vrot.slane %v276_v36, 1 }
 0x120   :  { %1759 = vmatpush1.bf16.msra.mxu1 %v1758_v21  ;;  %v1774_v21 = vpack.c.bf16 %v588_v1, %v586_v12  ;;  %v332_v47 = vadd.f32 %v331_v18, %v330_v7  ;;  %v221_v40 = vrot.slane %v220_v30, 1 }
 0x121   :  { %2015 = vmatpush1.bf16.msra.mxu0 %v2014_v22  ;;  %1761 = vmatprep.subr.bf16.mxu1 %v1760_v3  ;;  %v2030_v22 = vpack.c.bf16 %v844_v16, %v842_v15  ;;  %v1776_v3 = vpack.c.bf16 %v593_v2, %v591_v34  ;;  %v278_v60 = vadd.f32 %v277_v38, %v276_v36 }
 0x122   :  { %2017 = vmatprep.subr.bf16.mxu0 %v2016_v48  ;;  %v2032_v48 = vpack.c.bf16 %v849_v20, %v847_v19  ;;  %v333_v49 = vrot.slane %v332_v47, 1 }
 0x123   :  { %v905_v46 = vsel %vm898_vm0, %v278_v60, %v166_v57 }
 0x124   :  { %1763 = vmatpush1.bf16.msra.mxu1 %v1762_v32  ;;  %v1778_v32 = vpack.c.bf16 %v592_v25, %v590_v24 }
 0x125   :  { %2019 = vmatpush1.bf16.msra.mxu0 %v2018_v42  ;;  %1765 = vmatprep.subr.bf16.mxu1 %v1764_v43  ;;  %v1780_v42 = vpack.c.bf16 %v597_v59, %v595_v58  ;;  %v594_v43 = vld [vmem:[#allocation5 + $0x7e0] sm:$0xff] }
 0x126   :  { %2021 = vmatprep.subr.bf16.mxu0 %v2020_v55  ;;  %v852_v55 = vld [vmem:[#allocation5 + $0xff0] sm:$0xff]  ;;  %v1782_v56 = vpack.c.bf16 %v596_v44, %v594_v43 }
 0x127   :  { %v2038_v41 = vpack.c.bf16 %v852_v55, %v850_v51 }
 0x128   :  { %1767 = vmatpush1.bf16.msra.mxu1 %v1766_v61  ;;  %v222_v61 = vadd.f32 %v221_v40, %v220_v30 }
 0x129   :  { %2023 = vmatpush1.bf16.msra.mxu0 %v2022_v45  ;;  %1769 = vmatprep.subr.bf16.mxu1 %v1768_v63  ;;  %v334_v45 = vadd.f32 %v333_v49, %v332_v47  ;;  %v856_v63 = vlaneseq }
 0x12a   :  { %2025 = vmatprep.subr.bf16.mxu0 %v2024_v8 }
 0x12b   :  { %v913_v62 = vsel %vm898_vm0, %v334_v45, %v222_v61  ;;  %v857_v0 = vshrl.u32 %v856_v63, 7 }
 0x12c   :  { %1771 = vmatpush1.bf16.msra.mxu1 %v1770_v53 }
 0x12d   :  { %2027 = vmatpush1.bf16.msra.mxu0 %v2026_v28  ;;  %1773 = vmatprep.subr.bf16.mxu1 %v1772_v54  ;;  %v858_v52 = vsub.s32 0, %v857_v0  ;;  %v862_v6 = vsub.s32 1, %v857_v0 }
 0x12e   :  { %2029 = vmatprep.subr.bf16.mxu0 %v2028_v33 }
 0x12f   :  { %v859_v7 = vrot.slane %v854_v5, %v858_v52  ;;  %v863_v8 = vrot.slane %v854_v5, %v862_v6 }
 0x130   :  { %1775 = vmatpush1.bf16.msra.mxu1 %v1774_v21 }
 0x131   :  { %2031 = vmatpush1.bf16.msra.mxu0 %v2030_v22  ;;  %1777 = vmatprep.subr.bf16.mxu1 %v1776_v3 }
 0x132   :  { %2033 = vmatprep.subr.bf16.mxu0 %v2032_v48 }
 0x134   :  { %1779 = vmatpush1.bf16.msra.mxu1 %v1778_v32 }
 0x135   :  { %2035 = vmatpush1.bf16.msra.mxu0 %v2034_v39  ;;  %1781 = vmatprep.subr.bf16.mxu1 %v1780_v42 }
 0x136   :  { %2037 = vmatprep.subr.bf16.mxu0 %v2036_v50 }
 0x138   :  { %1783 = vmatpush1.bf16.msra.mxu1 %v1782_v56 }
 0x139   :  { %2039 = vmatpush1.bf16.msra.mxu0 %v2038_v41 }
 0x13b   :  { %1209 = vmatmul.mubr.f32.vlgmr.msra.gmra.mrb[0].mxu1 %v905_v46 }
 0x13c   :  { %1493 = vmatmul.mubr.f32.vlgmr.msra.gmra.mrb[0].mxu0 %v913_v62 }
 0x20e   :  { %v1210_v9 = vpop.f32.mrb[0].mxu1 }
 0x20f   :  { %v2040_v10 = vadd.f32 %v1210_v9, %v859_v7  ;;  %v1494_v11 = vpop.f32.mrb[0].mxu0  ;;  %v1212_v23 = vpop.f32.mrb[1].mxu1 }
 0x210   :  { %v2042_v26 = vadd.f32 %v1212_v23, %v863_v8  ;;  %v1496_v53 = vpop.f32.mrb[1].mxu0 }
 0x211   :  { %v2041_v12 = vadd.f32 %v2040_v10, %v1494_v11 }
 0x212   :  { %v2043_v14 = vadd.f32 %v2042_v26, %v1496_v53 }
 0x214   :  { %v1501_v27 = vcombine.low %v2041_v12, %v2043_v14 }
 0x216   :  { %1527 = vst.sshfl [vmem:[#allocation8] sm:$0x33 pattern:$0x76325410] %v1501_v27 }
 0x217   :  { %2141 = shalt.err (!%p2138_p0)
}
 0x218   :  { %s2142_s27 = scalar_lea.hbm %s2415_s3, 64 }
 0x219   :  { %p2143_p1 = scmp.ne.s32.totalorder %s2415_s3, %s2142_s27  ;;  %p2146_p2 = scmp.lt.u32.totalorder %s2142_s27, %s2415_s3 }
 0x21b   :  { %p2148_p3 = pnand %p2146_p2, %p2143_p1 }
 0x21d   :  { %2151 = shalt.err (!%p2148_p3)
}
 0x21e   :  { %1520 = dma.vmem_to_hbm [thread:$0]  %s1518_s23, 64, %s2415_s3, [#allocation4]  }
 0x21f   :  { %2156 = dma.done.wait [#allocation4], 64  }
 0x220   :  { %2157 = vsyncadd [#allocation4], 4294967232 }
 0x221   :  { %1524 = vsyncpa [#allocation3], 1 }
 0x222   :  { %1525 = vsyncpa [#allocation6], 1 }
 0x223   :  { %1526 = vsyncpa [#allocation4], 1 }

</bundles_post_ra>
